<compile_context>
chip_gen: v5e
topology: v5e:2x2
jax: 0.10.0
libtpu: 0.0.40
codegen_flags: <defaults>
</compile_context>

<pallas_src>
import jax
import jax.numpy as jnp
from jax.experimental import pallas as pl
from jax.experimental.pallas import tpu as pltpu

LANE = 128


def _round_up(x, m):
    return ((x + m - 1) // m) * m


def _pick_row_block(n):
    """Largest multiple-of-8 row block dividing n (capped at 256), preferring
    >=2 grid steps so the x DMA overlaps the projection matmuls."""
    cap = min(256, n // 2)
    best = None
    rb = 8
    while rb <= cap:
        if n % rb == 0:
            best = rb
        rb += 8
    return best if best is not None else n


# ----------------------------------------------------------------------------
# Fused kernel: pre (Linear+ReLU) -> packed input projection  [pipelined over N]
#               -> LSTM recurrence -> post MLP + log_softmax  [last grid step]
# ----------------------------------------------------------------------------
def _fused_kernel(x_ref, pre_w_ref, pre_b_ref, w_ih_ref, w_hh_ref, b_ref,
                  h0_ref, c0_ref, w1_ref, b1_ref, w2_ref, b2_ref,
                  logp_ref, hT_ref, cT_ref,
                  gates_sc, y_sc):
    blk = pl.program_id(0)
    rb = x_ref.shape[0]
    n, four_h = gates_sc.shape
    batch, hidden = h0_ref.shape
    seq_len = n // batch

    # ---- phase 1 (every grid step): pre + packed input projection, bf16 MXU ----
    feats = jnp.maximum(
        jnp.dot(x_ref[...].astype(jnp.bfloat16), pre_w_ref[...],
                preferred_element_type=jnp.float32) + pre_b_ref[...], 0.0)
    gx = jnp.dot(feats.astype(jnp.bfloat16), w_ih_ref[...],
                 preferred_element_type=jnp.float32) + b_ref[...]
    row0 = pl.multiple_of(blk * rb, rb)
    gates_sc[pl.ds(row0, rb), :] = gx                     # lane-dense, aligned

    # ---- phase 2 (last grid step): recurrence + post MLP + log_softmax ----
    @pl.when(blk == pl.num_programs(0) - 1)
    def _():
        w_hh = w_hh_ref[...]                              # (H, 4H) packed, f32
        lane = jax.lax.broadcasted_iota(jnp.int32, (batch, four_h), 1)
        g_mask = (lane >= 2 * hidden) & (lane < 3 * hidden)   # tanh lanes (gate g)

        h = h0_ref[...]
        c = c0_ref[...]
        # TODO(synk): partial-unroll fori_loop once seq_len grows (vreg pressure)
        for t in range(seq_len):
            # single lane-dense MXU dot per step on the serial path
            z = gates_sc[pl.ds(t * batch, batch), :] + jnp.dot(
                h, w_hh, preferred_element_type=jnp.float32)      # (B, 4H)
            sig = jax.nn.sigmoid(z)                               # 1 EUP push
            tnh = jnp.tanh(z)                                     # 1 EUP push
            acts = jnp.where(g_mask, tnh, sig)
            i_g = acts[:, 0 * hidden:1 * hidden]   # PyTorch gate order i,f,g,o
            f_g = acts[:, 1 * hidden:2 * hidden]
            g_g = acts[:, 2 * hidden:3 * hidden]
            o_g = acts[:, 3 * hidden:4 * hidden]
            c = f_g * c + i_g * g_g
            h = o_g * jnp.tanh(c)
            y_sc[pl.ds(t * batch, batch), :] = h
        hT_ref[...] = h
        cT_ref[...] = c

        # post: Linear + ReLU + Linear + log_softmax (lane-padded classes)
        hdn = jnp.maximum(
            jnp.dot(y_sc[...].astype(jnp.bfloat16), w1_ref[...],
                    preferred_element_type=jnp.float32) + b1_ref[...], 0.0)
        logits = jnp.dot(hdn.astype(jnp.bfloat16), w2_ref[...],
                         preferred_element_type=jnp.float32) + b2_ref[...]
        m = jnp.max(logits, axis=-1, keepdims=True)
        zc = logits - m
        lse = jnp.log(jnp.sum(jnp.exp(zc), axis=-1, keepdims=True))
        logp_ref[...] = zc - lse


# ----------------------------------------------------------------------------
# Wrapper
# ----------------------------------------------------------------------------
@jax.jit
def lstm_agent_forward(x, params, mem=None):
    """x: (T, B, C, H, W) float32.  Returns (log_probs (T,B,CLASSES), (h, c))."""
    seq_len, batch = x.shape[0], x.shape[1]
    pixels = x.shape[2] * x.shape[3] * x.shape[4]
    n = seq_len * batch
    hidden = params["w_hh"].shape[0]
    classes = params["post_w2"].shape[1]
    c_pad = _round_up(classes, LANE)
    rb = _pick_row_block(n)

    x_flat = x.reshape(n, pixels)
    if mem is None:
        h0 = jnp.zeros((batch, hidden), jnp.float32)
        c0 = jnp.zeros((batch, hidden), jnp.float32)
    else:
        h0, c0 = mem

    # Lane-dense output: pad classifier columns to a multiple of 128; padded
    # logits get a huge negative bias (exp underflows to 0) and are sliced off.
    w2p = jnp.pad(params["post_w2"], ((0, 0), (0, c_pad - classes)))
    b2p = jnp.pad(params["post_b2"], ((0, 0), (0, c_pad - classes)),
                  constant_values=-1e30)

    # bf16 operands for the large, non-recurrent matmuls (f32 accumulation).
    pre_w = params["pre_w"].astype(jnp.bfloat16)
    w_ih = params["w_ih"].astype(jnp.bfloat16)
    w1 = params["post_w1"].astype(jnp.bfloat16)
    w2p = w2p.astype(jnp.bfloat16)

    f_in = params["pre_w"].shape[1]
    post_hidden = params["post_w1"].shape[1]
    flops = int(2 * n * (pixels * f_in + f_in * 4 * hidden
                         + hidden * post_hidden + post_hidden * c_pad)
                + 2 * seq_len * batch * hidden * 4 * hidden)
    transcendentals = int(9 * n * hidden + n * (c_pad + 1))
    bytes_accessed = int(
        4 * (x_flat.size + n * c_pad + 4 * batch * hidden)
        + 2 * (pre_w.size + w_ih.size + w1.size + w2p.size)
        + 4 * (params["pre_b"].size + params["w_hh"].size
               + params["lstm_b"].size + params["post_b1"].size + b2p.size))

    def _const2(shape):
        return pl.BlockSpec(shape, lambda i: (0, 0))

    logp_pad, h_t, c_t = pl.pallas_call(
        _fused_kernel,
        grid=(n // rb,),
        in_specs=[
            pl.BlockSpec((rb, pixels), lambda i: (i, 0)),   # x: row-blocked, pipelined
            _const2(pre_w.shape), _const2(params["pre_b"].shape),
            _const2(w_ih.shape), _const2(params["w_hh"].shape),
            _const2(params["lstm_b"].shape),
            _const2((batch, hidden)), _const2((batch, hidden)),
            _const2(w1.shape), _const2(params["post_b1"].shape),
            _const2(w2p.shape), _const2(b2p.shape),
        ],
        out_specs=(
            _const2((n, c_pad)),
            _const2((batch, hidden)),
            _const2((batch, hidden)),
        ),
        out_shape=(
            jax.ShapeDtypeStruct((n, c_pad), jnp.float32),
            jax.ShapeDtypeStruct((batch, hidden), jnp.float32),
            jax.ShapeDtypeStruct((batch, hidden), jnp.float32),
        ),
        scratch_shapes=[
            pltpu.VMEM((n, 4 * hidden), jnp.float32),   # packed gate pre-activations
            pltpu.VMEM((n, hidden), jnp.float32),       # LSTM outputs y
        ],
        input_output_aliases={6: 1, 7: 2},   # h0 -> hT, c0 -> cT
        compiler_params=pltpu.CompilerParams(
            dimension_semantics=("arbitrary",),   # scratch carried across grid steps
            vmem_limit_bytes=48 * 1024 * 1024),
        cost_estimate=pl.CostEstimate(flops=flops,
                                      transcendentals=transcendentals,
                                      bytes_accessed=bytes_accessed),
    )(x_flat, pre_w, params["pre_b"], w_ih, params["w_hh"],
      params["lstm_b"], h0, c0, w1, params["post_b1"], w2p, b2p)

    logp = logp_pad[:, :classes].reshape(seq_len, batch, classes)
    return logp, (h_t, c_t)


# ----------------------------------------------------------------------------
# Deterministic parameter init (PyTorch-style uniform(-1/sqrt(fan), 1/sqrt(fan)))
# LSTM weights stored lane-packed in PyTorch gate order [ i | f | g | o ].
# ----------------------------------------------------------------------------
def init_params(key, pixels, f_in, hidden, post_hidden, classes):
    ks = jax.random.split(key, 10)

    def unif(k, shape, fan_in):
        bound = 1.0 / jnp.sqrt(float(fan_in))
        return jax.random.uniform(k, shape, jnp.float32, -bound, bound)

    return {
        "pre_w": unif(ks[0], (pixels, f_in), pixels),
        "pre_b": unif(ks[1], (1, f_in), pixels),
        "w_ih": unif(ks[2], (f_in, 4 * hidden), hidden),
        "w_hh": unif(ks[3], (hidden, 4 * hidden), hidden),
        # b = b_ih + b_hh folded together
        "lstm_b": unif(ks[4], (1, 4 * hidden), hidden)
                  + unif(ks[5], (1, 4 * hidden), hidden),
        "post_w1": unif(ks[6], (hidden, post_hidden), hidden),
        "post_b1": unif(ks[7], (1, post_hidden), hidden),
        "post_w2": unif(ks[8], (post_hidden, classes), post_hidden),
        "post_b2": unif(ks[9], (1, classes), post_hidden),
    }


# ----------------------------------------------------------------------------
# Pure-JAX f32 reference for a correctness check
# ----------------------------------------------------------------------------
def reference_forward(x, params, mem=None):
    seq_len, batch = x.shape[0], x.shape[1]
    pixels = x.shape[2] * x.shape[3] * x.shape[4]
    feats = jnp.maximum(x.reshape(seq_len * batch, pixels) @ params["pre_w"]
                        + params["pre_b"], 0.0)
    hidden = params["w_hh"].shape[0]
    feats = feats.reshape(seq_len, batch, -1)
    h = jnp.zeros((batch, hidden), jnp.float32) if mem is None else mem[0]
    c = jnp.zeros((batch, hidden), jnp.float32) if mem is None else mem[1]
    w_ih, w_hh, b = params["w_ih"], params["w_hh"], params["lstm_b"]

    def step(carry, x_t):
        h, c = carry
        z = x_t @ w_ih + h @ w_hh + b
        i, f, g, o = jnp.split(z, 4, axis=1)   # PyTorch gate order i, f, g, o
        i = jax.nn.sigmoid(i)
        f = jax.nn.sigmoid(f)
        g = jnp.tanh(g)
        o = jax.nn.sigmoid(o)
        c = f * c + i * g
        h = o * jnp.tanh(c)
        return (h, c), h

    (h, c), y = jax.lax.scan(step, (h, c), feats)
    y_flat = y.reshape(seq_len * batch, hidden)
    hdn = jnp.maximum(y_flat @ params["post_w1"] + params["post_b1"], 0.0)
    logits = hdn @ params["post_w2"] + params["post_b2"]
    logp = jax.nn.log_softmax(logits, axis=1)
    return logp.reshape(seq_len, batch, -1), (h, c)


# ----------------------------------------------------------------------------
if __name__ == "__main__":
    # small shapes consistent with the module's forward
    T, B, C, H, W = 8, 2, 1, 16, 16           # sequence of 16x16 single-channel frames
    F_IN, F_OUT = 32, 32                      # features_in_size, features_out_size
    POST_HIDDEN, CLASSES = 64, 10
    PIXELS = C * H * W

    key = jax.random.PRNGKey(0)
    k_x, k_p = jax.random.split(key)
    x = jax.random.normal(k_x, (T, B, C, H, W), jnp.float32)
    params = init_params(k_p, PIXELS, F_IN, F_OUT, POST_HIDDEN, CLASSES)

    # fresh state
    logp, (h_t, c_t) = lstm_agent_forward(x, params)
    jax.block_until_ready((logp, h_t, c_t))

    ref_logp, (ref_h, ref_c) = reference_forward(x, params)
    assert logp.shape == (T, B, CLASSES)
    assert h_t.shape == (B, F_OUT) and c_t.shape == (B, F_OUT)
    # bf16 MXU operands on the non-recurrent matmuls -> bf16-level tolerance vs f32 ref
    TOL = dict(atol=3e-2, rtol=3e-2)
    assert jnp.allclose(logp, ref_logp, **TOL)
    assert jnp.allclose(h_t, ref_h, **TOL)
    assert jnp.allclose(c_t, ref_c, **TOL)

    # carried-state call (exercises the h0/c0 -> hT/cT aliasing path)
    logp2, (h_t2, c_t2) = lstm_agent_forward(x, params, (h_t, c_t))
    jax.block_until_ready((logp2, h_t2, c_t2))
    ref_logp2, (ref_h2, ref_c2) = reference_forward(x, params, (ref_h, ref_c))
    assert jnp.allclose(logp2, ref_logp2, **TOL)
    assert jnp.allclose(h_t2, ref_h2, **TOL)
    assert jnp.allclose(c_t2, ref_c2, **TOL)

    print("KERNEL_OK")
</pallas_src>

<mosaic_0001>
module attributes {stable_mosaic.version = 11 : i64} {
  func.func @_fused_kernel(%arg0: i32, %arg1: memref<8x256xf32, #tpu.memory_space<vmem>>, %arg2: memref<256x32xbf16, #tpu.memory_space<vmem>>, %arg3: memref<1x32xf32, #tpu.memory_space<vmem>>, %arg4: memref<32x128xbf16, #tpu.memory_space<vmem>>, %arg5: memref<32x128xf32, #tpu.memory_space<vmem>>, %arg6: memref<1x128xf32, #tpu.memory_space<vmem>>, %arg7: memref<2x32xf32, #tpu.memory_space<vmem>>, %arg8: memref<2x32xf32, #tpu.memory_space<vmem>>, %arg9: memref<32x64xbf16, #tpu.memory_space<vmem>>, %arg10: memref<1x64xf32, #tpu.memory_space<vmem>>, %arg11: memref<64x128xbf16, #tpu.memory_space<vmem>>, %arg12: memref<1x128xf32, #tpu.memory_space<vmem>>, %arg13: memref<16x128xf32, #tpu.memory_space<vmem>>, %arg14: memref<2x32xf32, #tpu.memory_space<vmem>>, %arg15: memref<2x32xf32, #tpu.memory_space<vmem>>, %arg16: memref<16x128xf32, #tpu.memory_space<vmem>>, %arg17: memref<16x32xf32, #tpu.memory_space<vmem>>) attributes {dimension_semantics = [#tpu.dimension_semantics<arbitrary>], iteration_bounds = array<i64: 2>, scalar_prefetch = 0 : i64, scratch_operands = 2 : i64, tpu.core_type = #tpu.core_type<tc>, window_params = [{transform_indices = @transform_0, window_bounds = array<i64: 8, 256>}, {pipeline_mode = #tpu.pipeline_mode<synchronous>, transform_indices = @transform_1, window_bounds = array<i64: 256, 32>}, {pipeline_mode = #tpu.pipeline_mode<synchronous>, transform_indices = @transform_2, window_bounds = array<i64: 1, 32>}, {pipeline_mode = #tpu.pipeline_mode<synchronous>, transform_indices = @transform_3, window_bounds = array<i64: 32, 128>}, {pipeline_mode = #tpu.pipeline_mode<synchronous>, transform_indices = @transform_4, window_bounds = array<i64: 32, 128>}, {pipeline_mode = #tpu.pipeline_mode<synchronous>, transform_indices = @transform_5, window_bounds = array<i64: 1, 128>}, {pipeline_mode = #tpu.pipeline_mode<synchronous>, transform_indices = @transform_6, window_bounds = array<i64: 2, 32>}, {pipeline_mode = #tpu.pipeline_mode<synchronous>, transform_indices = @transform_7, window_bounds = array<i64: 2, 32>}, {pipeline_mode = #tpu.pipeline_mode<synchronous>, transform_indices = @transform_8, window_bounds = array<i64: 32, 64>}, {pipeline_mode = #tpu.pipeline_mode<synchronous>, transform_indices = @transform_9, window_bounds = array<i64: 1, 64>}, {pipeline_mode = #tpu.pipeline_mode<synchronous>, transform_indices = @transform_10, window_bounds = array<i64: 64, 128>}, {pipeline_mode = #tpu.pipeline_mode<synchronous>, transform_indices = @transform_11, window_bounds = array<i64: 1, 128>}, {pipeline_mode = #tpu.pipeline_mode<synchronous>, transform_indices = @transform_12, window_bounds = array<i64: 16, 128>}, {pipeline_mode = #tpu.pipeline_mode<synchronous>, transform_indices = @transform_13, window_bounds = array<i64: 2, 32>}, {pipeline_mode = #tpu.pipeline_mode<synchronous>, transform_indices = @transform_14, window_bounds = array<i64: 2, 32>}]} {
    %c0 = arith.constant 0 : index
    %c0_0 = arith.constant 0 : index
    %0 = vector.load %arg1[%c0, %c0_0] : memref<8x256xf32, #tpu.memory_space<vmem>>, vector<8x256xf32>
    %1 = arith.truncf %0 : vector<8x256xf32> to vector<8x256xbf16>
    %c0_1 = arith.constant 0 : index
    %c0_2 = arith.constant 0 : index
    %2 = vector.load %arg2[%c0_1, %c0_2] : memref<256x32xbf16, #tpu.memory_space<vmem>>, vector<256x32xbf16>
    %cst = arith.constant dense<0.000000e+00> : vector<8x32xf32>
    %3 = tpu.matmul %1, %2, %cst {dimension_numbers = #tpu.dot_dimension_numbers<[1], [0], [0], [1], [0, 0, 1, 1], [], []>} : vector<8x256xbf16>, vector<256x32xbf16>, vector<8x32xf32> -> vector<8x32xf32>
    %c0_3 = arith.constant 0 : index
    %c0_4 = arith.constant 0 : index
    %4 = vector.load %arg3[%c0_3, %c0_4] : memref<1x32xf32, #tpu.memory_space<vmem>>, vector<1x32xf32>
    %5 = vector.broadcast %4 : vector<1x32xf32> to vector<8x32xf32>
    %6 = arith.addf %3, %5 : vector<8x32xf32>
    %cst_5 = arith.constant 0.000000e+00 : f32
    %7 = vector.broadcast %cst_5 : f32 to vector<8x32xf32>
    %8 = arith.maximumf %6, %7 : vector<8x32xf32>
    %9 = arith.truncf %8 : vector<8x32xf32> to vector<8x32xbf16>
    %c0_6 = arith.constant 0 : index
    %c0_7 = arith.constant 0 : index
    %10 = vector.load %arg4[%c0_6, %c0_7] : memref<32x128xbf16, #tpu.memory_space<vmem>>, vector<32x128xbf16>
    %cst_8 = arith.constant dense<0.000000e+00> : vector<8x128xf32>
    %11 = tpu.matmul %9, %10, %cst_8 {dimension_numbers = #tpu.dot_dimension_numbers<[1], [0], [0], [1], [0, 0, 1, 1], [], []>} : vector<8x32xbf16>, vector<32x128xbf16>, vector<8x128xf32> -> vector<8x128xf32>
    %c0_9 = arith.constant 0 : index
    %c0_10 = arith.constant 0 : index
    %12 = vector.load %arg6[%c0_9, %c0_10] : memref<1x128xf32, #tpu.memory_space<vmem>>, vector<1x128xf32>
    %13 = vector.broadcast %12 : vector<1x128xf32> to vector<8x128xf32>
    %14 = arith.addf %11, %13 : vector<8x128xf32>
    %c8_i32 = arith.constant 8 : i32
    %15 = arith.muli %arg0, %c8_i32 : i32
    %16 = tpu.assume_multiple %15, 8 : i32
    %17 = arith.index_cast %16 : i32 to index
    %c0_11 = arith.constant 0 : index
    %18 = vector.load %arg16[%17, %c0_11] : memref<16x128xf32, #tpu.memory_space<vmem>>, vector<8x128xf32>
    tpu.vector_store %arg16[%17, %c0_11], %14 {strides = array<i32>} : memref<16x128xf32, #tpu.memory_space<vmem>>, vector<8x128xf32>,
    %c1_i32 = arith.constant 1 : i32
    %19 = arith.cmpi eq, %arg0, %c1_i32 : i32
    %20 = arith.extui %19 : i1 to i32
    %c0_i32 = arith.constant 0 : i32
    %21 = arith.cmpi ne, %20, %c0_i32 : i32
    scf.if %21 {
      %c0_12 = arith.constant 0 : index
      %c0_13 = arith.constant 0 : index
      %22 = vector.load %arg5[%c0_12, %c0_13] : memref<32x128xf32, #tpu.memory_space<vmem>>, vector<32x128xf32>
      %23 = tpu.iota {dimensions = array<i32: 1>} : vector<2x128xi32>
      %c64_i32 = arith.constant 64 : i32
      %24 = vector.broadcast %c64_i32 : i32 to vector<2x128xi32>
      %25 = arith.cmpi sge, %23, %24 : vector<2x128xi32>
      %c96_i32 = arith.constant 96 : i32
      %26 = vector.broadcast %c96_i32 : i32 to vector<2x128xi32>
      %27 = arith.cmpi slt, %23, %26 : vector<2x128xi32>
      %28 = arith.andi %25, %27 : vector<2x128xi1>
      %c0_14 = arith.constant 0 : index
      %c0_15 = arith.constant 0 : index
      %29 = vector.load %arg7[%c0_14, %c0_15] : memref<2x32xf32, #tpu.memory_space<vmem>>, vector<2x32xf32>
      %c0_16 = arith.constant 0 : index
      %c0_17 = arith.constant 0 : index
      %30 = vector.load %arg8[%c0_16, %c0_17] : memref<2x32xf32, #tpu.memory_space<vmem>>, vector<2x32xf32>
      %c0_18 = arith.constant 0 : index
      %c0_19 = arith.constant 0 : index
      %31 = vector.load %arg16[%c0_18, %c0_19] : memref<16x128xf32, #tpu.memory_space<vmem>>, vector<2x128xf32>
      %cst_20 = arith.constant dense<0.000000e+00> : vector<2x128xf32>
      %32 = tpu.matmul %29, %22, %cst_20 {dimension_numbers = #tpu.dot_dimension_numbers<[1], [0], [0], [1], [0, 0, 1, 1], [], []>} : vector<2x32xf32>, vector<32x128xf32>, vector<2x128xf32> -> vector<2x128xf32>
      %33 = arith.addf %31, %32 : vector<2x128xf32>
      %34 = arith.negf %33 : vector<2x128xf32>
      %35 = math.exp %34 : vector<2x128xf32>
      %cst_21 = arith.constant 1.000000e+00 : f32
      %36 = vector.broadcast %cst_21 : f32 to vector<2x128xf32>
      %37 = arith.addf %36, %35 : vector<2x128xf32>
      %38 = arith.divf %36, %37 : vector<2x128xf32>
      %39 = math.tanh %33 : vector<2x128xf32>
      %40 = arith.select %28, %39, %38 : vector<2x128xi1>, vector<2x128xf32>
      %41 = vector.extract_strided_slice %40 {offsets = [0, 0], sizes = [2, 32], strides = [1, 1]} : vector<2x128xf32> to vector<2x32xf32>
      %42 = vector.extract_strided_slice %40 {offsets = [0, 32], sizes = [2, 32], strides = [1, 1]} : vector<2x128xf32> to vector<2x32xf32>
      %43 = vector.extract_strided_slice %40 {offsets = [0, 64], sizes = [2, 32], strides = [1, 1]} : vector<2x128xf32> to vector<2x32xf32>
      %44 = vector.extract_strided_slice %40 {offsets = [0, 96], sizes = [2, 32], strides = [1, 1]} : vector<2x128xf32> to vector<2x32xf32>
      %45 = arith.mulf %42, %30 : vector<2x32xf32>
      %46 = arith.mulf %41, %43 : vector<2x32xf32>
      %47 = arith.addf %45, %46 : vector<2x32xf32>
      %48 = math.tanh %47 : vector<2x32xf32>
      %49 = arith.mulf %44, %48 : vector<2x32xf32>
      %c0_22 = arith.constant 0 : index
      %c0_23 = arith.constant 0 : index
      %50 = vector.load %arg17[%c0_22, %c0_23] : memref<16x32xf32, #tpu.memory_space<vmem>>, vector<2x32xf32>
      tpu.vector_store %arg17[%c0_22, %c0_23], %49 {strides = array<i32>} : memref<16x32xf32, #tpu.memory_space<vmem>>, vector<2x32xf32>,
      %c2 = arith.constant 2 : index
      %c0_24 = arith.constant 0 : index
      %51 = vector.load %arg16[%c2, %c0_24] : memref<16x128xf32, #tpu.memory_space<vmem>>, vector<2x128xf32>
      %cst_25 = arith.constant dense<0.000000e+00> : vector<2x128xf32>
      %52 = tpu.matmul %49, %22, %cst_25 {dimension_numbers = #tpu.dot_dimension_numbers<[1], [0], [0], [1], [0, 0, 1, 1], [], []>} : vector<2x32xf32>, vector<32x128xf32>, vector<2x128xf32> -> vector<2x128xf32>
      %53 = arith.addf %51, %52 : vector<2x128xf32>
      %54 = arith.negf %53 : vector<2x128xf32>
      %55 = math.exp %54 : vector<2x128xf32>
      %cst_26 = arith.constant 1.000000e+00 : f32
      %56 = vector.broadcast %cst_26 : f32 to vector<2x128xf32>
      %57 = arith.addf %56, %55 : vector<2x128xf32>
      %58 = arith.divf %56, %57 : vector<2x128xf32>
      %59 = math.tanh %53 : vector<2x128xf32>
      %60 = arith.select %28, %59, %58 : vector<2x128xi1>, vector<2x128xf32>
      %61 = vector.extract_strided_slice %60 {offsets = [0, 0], sizes = [2, 32], strides = [1, 1]} : vector<2x128xf32> to vector<2x32xf32>
      %62 = vector.extract_strided_slice %60 {offsets = [0, 32], sizes = [2, 32], strides = [1, 1]} : vector<2x128xf32> to vector<2x32xf32>
      %63 = vector.extract_strided_slice %60 {offsets = [0, 64], sizes = [2, 32], strides = [1, 1]} : vector<2x128xf32> to vector<2x32xf32>
      %64 = vector.extract_strided_slice %60 {offsets = [0, 96], sizes = [2, 32], strides = [1, 1]} : vector<2x128xf32> to vector<2x32xf32>
      %65 = arith.mulf %62, %47 : vector<2x32xf32>
      %66 = arith.mulf %61, %63 : vector<2x32xf32>
      %67 = arith.addf %65, %66 : vector<2x32xf32>
      %68 = math.tanh %67 : vector<2x32xf32>
      %69 = arith.mulf %64, %68 : vector<2x32xf32>
      %c2_27 = arith.constant 2 : index
      %c0_28 = arith.constant 0 : index
      %70 = vector.load %arg17[%c2_27, %c0_28] : memref<16x32xf32, #tpu.memory_space<vmem>>, vector<2x32xf32>
      tpu.vector_store %arg17[%c2_27, %c0_28], %69 {strides = array<i32>} : memref<16x32xf32, #tpu.memory_space<vmem>>, vector<2x32xf32>,
      %c4 = arith.constant 4 : index
      %c0_29 = arith.constant 0 : index
      %71 = vector.load %arg16[%c4, %c0_29] : memref<16x128xf32, #tpu.memory_space<vmem>>, vector<2x128xf32>
      %cst_30 = arith.constant dense<0.000000e+00> : vector<2x128xf32>
      %72 = tpu.matmul %69, %22, %cst_30 {dimension_numbers = #tpu.dot_dimension_numbers<[1], [0], [0], [1], [0, 0, 1, 1], [], []>} : vector<2x32xf32>, vector<32x128xf32>, vector<2x128xf32> -> vector<2x128xf32>
      %73 = arith.addf %71, %72 : vector<2x128xf32>
      %74 = arith.negf %73 : vector<2x128xf32>
      %75 = math.exp %74 : vector<2x128xf32>
      %cst_31 = arith.constant 1.000000e+00 : f32
      %76 = vector.broadcast %cst_31 : f32 to vector<2x128xf32>
      %77 = arith.addf %76, %75 : vector<2x128xf32>
      %78 = arith.divf %76, %77 : vector<2x128xf32>
      %79 = math.tanh %73 : vector<2x128xf32>
      %80 = arith.select %28, %79, %78 : vector<2x128xi1>, vector<2x128xf32>
      %81 = vector.extract_strided_slice %80 {offsets = [0, 0], sizes = [2, 32], strides = [1, 1]} : vector<2x128xf32> to vector<2x32xf32>
      %82 = vector.extract_strided_slice %80 {offsets = [0, 32], sizes = [2, 32], strides = [1, 1]} : vector<2x128xf32> to vector<2x32xf32>
      %83 = vector.extract_strided_slice %80 {offsets = [0, 64], sizes = [2, 32], strides = [1, 1]} : vector<2x128xf32> to vector<2x32xf32>
      %84 = vector.extract_strided_slice %80 {offsets = [0, 96], sizes = [2, 32], strides = [1, 1]} : vector<2x128xf32> to vector<2x32xf32>
      %85 = arith.mulf %82, %67 : vector<2x32xf32>
      %86 = arith.mulf %81, %83 : vector<2x32xf32>
      %87 = arith.addf %85, %86 : vector<2x32xf32>
      %88 = math.tanh %87 : vector<2x32xf32>
      %89 = arith.mulf %84, %88 : vector<2x32xf32>
      %c4_32 = arith.constant 4 : index
      %c0_33 = arith.constant 0 : index
      %90 = vector.load %arg17[%c4_32, %c0_33] : memref<16x32xf32, #tpu.memory_space<vmem>>, vector<2x32xf32>
      tpu.vector_store %arg17[%c4_32, %c0_33], %89 {strides = array<i32>} : memref<16x32xf32, #tpu.memory_space<vmem>>, vector<2x32xf32>,
      %c6 = arith.constant 6 : index
      %c0_34 = arith.constant 0 : index
      %91 = vector.load %arg16[%c6, %c0_34] : memref<16x128xf32, #tpu.memory_space<vmem>>, vector<2x128xf32>
      %cst_35 = arith.constant dense<0.000000e+00> : vector<2x128xf32>
      %92 = tpu.matmul %89, %22, %cst_35 {dimension_numbers = #tpu.dot_dimension_numbers<[1], [0], [0], [1], [0, 0, 1, 1], [], []>} : vector<2x32xf32>, vector<32x128xf32>, vector<2x128xf32> -> vector<2x128xf32>
      %93 = arith.addf %91, %92 : vector<2x128xf32>
      %94 = arith.negf %93 : vector<2x128xf32>
      %95 = math.exp %94 : vector<2x128xf32>
      %cst_36 = arith.constant 1.000000e+00 : f32
      %96 = vector.broadcast %cst_36 : f32 to vector<2x128xf32>
      %97 = arith.addf %96, %95 : vector<2x128xf32>
      %98 = arith.divf %96, %97 : vector<2x128xf32>
      %99 = math.tanh %93 : vector<2x128xf32>
      %100 = arith.select %28, %99, %98 : vector<2x128xi1>, vector<2x128xf32>
      %101 = vector.extract_strided_slice %100 {offsets = [0, 0], sizes = [2, 32], strides = [1, 1]} : vector<2x128xf32> to vector<2x32xf32>
      %102 = vector.extract_strided_slice %100 {offsets = [0, 32], sizes = [2, 32], strides = [1, 1]} : vector<2x128xf32> to vector<2x32xf32>
      %103 = vector.extract_strided_slice %100 {offsets = [0, 64], sizes = [2, 32], strides = [1, 1]} : vector<2x128xf32> to vector<2x32xf32>
      %104 = vector.extract_strided_slice %100 {offsets = [0, 96], sizes = [2, 32], strides = [1, 1]} : vector<2x128xf32> to vector<2x32xf32>
      %105 = arith.mulf %102, %87 : vector<2x32xf32>
      %106 = arith.mulf %101, %103 : vector<2x32xf32>
      %107 = arith.addf %105, %106 : vector<2x32xf32>
      %108 = math.tanh %107 : vector<2x32xf32>
      %109 = arith.mulf %104, %108 : vector<2x32xf32>
      %c6_37 = arith.constant 6 : index
      %c0_38 = arith.constant 0 : index
      %110 = vector.load %arg17[%c6_37, %c0_38] : memref<16x32xf32, #tpu.memory_space<vmem>>, vector<2x32xf32>
      tpu.vector_store %arg17[%c6_37, %c0_38], %109 {strides = array<i32>} : memref<16x32xf32, #tpu.memory_space<vmem>>, vector<2x32xf32>,
      %c8 = arith.constant 8 : index
      %c0_39 = arith.constant 0 : index
      %111 = vector.load %arg16[%c8, %c0_39] : memref<16x128xf32, #tpu.memory_space<vmem>>, vector<2x128xf32>
      %cst_40 = arith.constant dense<0.000000e+00> : vector<2x128xf32>
      %112 = tpu.matmul %109, %22, %cst_40 {dimension_numbers = #tpu.dot_dimension_numbers<[1], [0], [0], [1], [0, 0, 1, 1], [], []>} : vector<2x32xf32>, vector<32x128xf32>, vector<2x128xf32> -> vector<2x128xf32>
      %113 = arith.addf %111, %112 : vector<2x128xf32>
      %114 = arith.negf %113 : vector<2x128xf32>
      %115 = math.exp %114 : vector<2x128xf32>
      %cst_41 = arith.constant 1.000000e+00 : f32
      %116 = vector.broadcast %cst_41 : f32 to vector<2x128xf32>
      %117 = arith.addf %116, %115 : vector<2x128xf32>
      %118 = arith.divf %116, %117 : vector<2x128xf32>
      %119 = math.tanh %113 : vector<2x128xf32>
      %120 = arith.select %28, %119, %118 : vector<2x128xi1>, vector<2x128xf32>
      %121 = vector.extract_strided_slice %120 {offsets = [0, 0], sizes = [2, 32], strides = [1, 1]} : vector<2x128xf32> to vector<2x32xf32>
      %122 = vector.extract_strided_slice %120 {offsets = [0, 32], sizes = [2, 32], strides = [1, 1]} : vector<2x128xf32> to vector<2x32xf32>
      %123 = vector.extract_strided_slice %120 {offsets = [0, 64], sizes = [2, 32], strides = [1, 1]} : vector<2x128xf32> to vector<2x32xf32>
      %124 = vector.extract_strided_slice %120 {offsets = [0, 96], sizes = [2, 32], strides = [1, 1]} : vector<2x128xf32> to vector<2x32xf32>
      %125 = arith.mulf %122, %107 : vector<2x32xf32>
      %126 = arith.mulf %121, %123 : vector<2x32xf32>
      %127 = arith.addf %125, %126 : vector<2x32xf32>
      %128 = math.tanh %127 : vector<2x32xf32>
      %129 = arith.mulf %124, %128 : vector<2x32xf32>
      %c8_42 = arith.constant 8 : index
      %c0_43 = arith.constant 0 : index
      %130 = vector.load %arg17[%c8_42, %c0_43] : memref<16x32xf32, #tpu.memory_space<vmem>>, vector<2x32xf32>
      tpu.vector_store %arg17[%c8_42, %c0_43], %129 {strides = array<i32>} : memref<16x32xf32, #tpu.memory_space<vmem>>, vector<2x32xf32>,
      %c10 = arith.constant 10 : index
      %c0_44 = arith.constant 0 : index
      %131 = vector.load %arg16[%c10, %c0_44] : memref<16x128xf32, #tpu.memory_space<vmem>>, vector<2x128xf32>
      %cst_45 = arith.constant dense<0.000000e+00> : vector<2x128xf32>
      %132 = tpu.matmul %129, %22, %cst_45 {dimension_numbers = #tpu.dot_dimension_numbers<[1], [0], [0], [1], [0, 0, 1, 1], [], []>} : vector<2x32xf32>, vector<32x128xf32>, vector<2x128xf32> -> vector<2x128xf32>
      %133 = arith.addf %131, %132 : vector<2x128xf32>
      %134 = arith.negf %133 : vector<2x128xf32>
      %135 = math.exp %134 : vector<2x128xf32>
      %cst_46 = arith.constant 1.000000e+00 : f32
      %136 = vector.broadcast %cst_46 : f32 to vector<2x128xf32>
      %137 = arith.addf %136, %135 : vector<2x128xf32>
      %138 = arith.divf %136, %137 : vector<2x128xf32>
      %139 = math.tanh %133 : vector<2x128xf32>
      %140 = arith.select %28, %139, %138 : vector<2x128xi1>, vector<2x128xf32>
      %141 = vector.extract_strided_slice %140 {offsets = [0, 0], sizes = [2, 32], strides = [1, 1]} : vector<2x128xf32> to vector<2x32xf32>
      %142 = vector.extract_strided_slice %140 {offsets = [0, 32], sizes = [2, 32], strides = [1, 1]} : vector<2x128xf32> to vector<2x32xf32>
      %143 = vector.extract_strided_slice %140 {offsets = [0, 64], sizes = [2, 32], strides = [1, 1]} : vector<2x128xf32> to vector<2x32xf32>
      %144 = vector.extract_strided_slice %140 {offsets = [0, 96], sizes = [2, 32], strides = [1, 1]} : vector<2x128xf32> to vector<2x32xf32>
      %145 = arith.mulf %142, %127 : vector<2x32xf32>
      %146 = arith.mulf %141, %143 : vector<2x32xf32>
      %147 = arith.addf %145, %146 : vector<2x32xf32>
      %148 = math.tanh %147 : vector<2x32xf32>
      %149 = arith.mulf %144, %148 : vector<2x32xf32>
      %c10_47 = arith.constant 10 : index
      %c0_48 = arith.constant 0 : index
      %150 = vector.load %arg17[%c10_47, %c0_48] : memref<16x32xf32, #tpu.memory_space<vmem>>, vector<2x32xf32>
      tpu.vector_store %arg17[%c10_47, %c0_48], %149 {strides = array<i32>} : memref<16x32xf32, #tpu.memory_space<vmem>>, vector<2x32xf32>,
      %c12 = arith.constant 12 : index
      %c0_49 = arith.constant 0 : index
      %151 = vector.load %arg16[%c12, %c0_49] : memref<16x128xf32, #tpu.memory_space<vmem>>, vector<2x128xf32>
      %cst_50 = arith.constant dense<0.000000e+00> : vector<2x128xf32>
      %152 = tpu.matmul %149, %22, %cst_50 {dimension_numbers = #tpu.dot_dimension_numbers<[1], [0], [0], [1], [0, 0, 1, 1], [], []>} : vector<2x32xf32>, vector<32x128xf32>, vector<2x128xf32> -> vector<2x128xf32>
      %153 = arith.addf %151, %152 : vector<2x128xf32>
      %154 = arith.negf %153 : vector<2x128xf32>
      %155 = math.exp %154 : vector<2x128xf32>
      %cst_51 = arith.constant 1.000000e+00 : f32
      %156 = vector.broadcast %cst_51 : f32 to vector<2x128xf32>
      %157 = arith.addf %156, %155 : vector<2x128xf32>
      %158 = arith.divf %156, %157 : vector<2x128xf32>
      %159 = math.tanh %153 : vector<2x128xf32>
      %160 = arith.select %28, %159, %158 : vector<2x128xi1>, vector<2x128xf32>
      %161 = vector.extract_strided_slice %160 {offsets = [0, 0], sizes = [2, 32], strides = [1, 1]} : vector<2x128xf32> to vector<2x32xf32>
      %162 = vector.extract_strided_slice %160 {offsets = [0, 32], sizes = [2, 32], strides = [1, 1]} : vector<2x128xf32> to vector<2x32xf32>
      %163 = vector.extract_strided_slice %160 {offsets = [0, 64], sizes = [2, 32], strides = [1, 1]} : vector<2x128xf32> to vector<2x32xf32>
      %164 = vector.extract_strided_slice %160 {offsets = [0, 96], sizes = [2, 32], strides = [1, 1]} : vector<2x128xf32> to vector<2x32xf32>
      %165 = arith.mulf %162, %147 : vector<2x32xf32>
      %166 = arith.mulf %161, %163 : vector<2x32xf32>
      %167 = arith.addf %165, %166 : vector<2x32xf32>
      %168 = math.tanh %167 : vector<2x32xf32>
      %169 = arith.mulf %164, %168 : vector<2x32xf32>
      %c12_52 = arith.constant 12 : index
      %c0_53 = arith.constant 0 : index
      %170 = vector.load %arg17[%c12_52, %c0_53] : memref<16x32xf32, #tpu.memory_space<vmem>>, vector<2x32xf32>
      tpu.vector_store %arg17[%c12_52, %c0_53], %169 {strides = array<i32>} : memref<16x32xf32, #tpu.memory_space<vmem>>, vector<2x32xf32>,
      %c14 = arith.constant 14 : index
      %c0_54 = arith.constant 0 : index
      %171 = vector.load %arg16[%c14, %c0_54] : memref<16x128xf32, #tpu.memory_space<vmem>>, vector<2x128xf32>
      %cst_55 = arith.constant dense<0.000000e+00> : vector<2x128xf32>
      %172 = tpu.matmul %169, %22, %cst_55 {dimension_numbers = #tpu.dot_dimension_numbers<[1], [0], [0], [1], [0, 0, 1, 1], [], []>} : vector<2x32xf32>, vector<32x128xf32>, vector<2x128xf32> -> vector<2x128xf32>
      %173 = arith.addf %171, %172 : vector<2x128xf32>
      %174 = arith.negf %173 : vector<2x128xf32>
      %175 = math.exp %174 : vector<2x128xf32>
      %cst_56 = arith.constant 1.000000e+00 : f32
      %176 = vector.broadcast %cst_56 : f32 to vector<2x128xf32>
      %177 = arith.addf %176, %175 : vector<2x128xf32>
      %178 = arith.divf %176, %177 : vector<2x128xf32>
      %179 = math.tanh %173 : vector<2x128xf32>
      %180 = arith.select %28, %179, %178 : vector<2x128xi1>, vector<2x128xf32>
      %181 = vector.extract_strided_slice %180 {offsets = [0, 0], sizes = [2, 32], strides = [1, 1]} : vector<2x128xf32> to vector<2x32xf32>
      %182 = vector.extract_strided_slice %180 {offsets = [0, 32], sizes = [2, 32], strides = [1, 1]} : vector<2x128xf32> to vector<2x32xf32>
      %183 = vector.extract_strided_slice %180 {offsets = [0, 64], sizes = [2, 32], strides = [1, 1]} : vector<2x128xf32> to vector<2x32xf32>
      %184 = vector.extract_strided_slice %180 {offsets = [0, 96], sizes = [2, 32], strides = [1, 1]} : vector<2x128xf32> to vector<2x32xf32>
      %185 = arith.mulf %182, %167 : vector<2x32xf32>
      %186 = arith.mulf %181, %183 : vector<2x32xf32>
      %187 = arith.addf %185, %186 : vector<2x32xf32>
      %188 = math.tanh %187 : vector<2x32xf32>
      %189 = arith.mulf %184, %188 : vector<2x32xf32>
      %c14_57 = arith.constant 14 : index
      %c0_58 = arith.constant 0 : index
      %190 = vector.load %arg17[%c14_57, %c0_58] : memref<16x32xf32, #tpu.memory_space<vmem>>, vector<2x32xf32>
      tpu.vector_store %arg17[%c14_57, %c0_58], %189 {strides = array<i32>} : memref<16x32xf32, #tpu.memory_space<vmem>>, vector<2x32xf32>,
      %c0_59 = arith.constant 0 : index
      %c0_60 = arith.constant 0 : index
      %191 = vector.load %arg14[%c0_59, %c0_60] : memref<2x32xf32, #tpu.memory_space<vmem>>, vector<2x32xf32>
      tpu.vector_store %arg14[%c0_59, %c0_60], %189 {strides = array<i32>} : memref<2x32xf32, #tpu.memory_space<vmem>>, vector<2x32xf32>,
      %c0_61 = arith.constant 0 : index
      %c0_62 = arith.constant 0 : index
      %192 = vector.load %arg15[%c0_61, %c0_62] : memref<2x32xf32, #tpu.memory_space<vmem>>, vector<2x32xf32>
      tpu.vector_store %arg15[%c0_61, %c0_62], %187 {strides = array<i32>} : memref<2x32xf32, #tpu.memory_space<vmem>>, vector<2x32xf32>,
      %c0_63 = arith.constant 0 : index
      %c0_64 = arith.constant 0 : index
      %193 = vector.load %arg17[%c0_63, %c0_64] : memref<16x32xf32, #tpu.memory_space<vmem>>, vector<16x32xf32>
      %194 = arith.truncf %193 : vector<16x32xf32> to vector<16x32xbf16>
      %c0_65 = arith.constant 0 : index
      %c0_66 = arith.constant 0 : index
      %195 = vector.load %arg9[%c0_65, %c0_66] : memref<32x64xbf16, #tpu.memory_space<vmem>>, vector<32x64xbf16>
      %cst_67 = arith.constant dense<0.000000e+00> : vector<16x64xf32>
      %196 = tpu.matmul %194, %195, %cst_67 {dimension_numbers = #tpu.dot_dimension_numbers<[1], [0], [0], [1], [0, 0, 1, 1], [], []>} : vector<16x32xbf16>, vector<32x64xbf16>, vector<16x64xf32> -> vector<16x64xf32>
      %c0_68 = arith.constant 0 : index
      %c0_69 = arith.constant 0 : index
      %197 = vector.load %arg10[%c0_68, %c0_69] : memref<1x64xf32, #tpu.memory_space<vmem>>, vector<1x64xf32>
      %198 = vector.broadcast %197 : vector<1x64xf32> to vector<16x64xf32>
      %199 = arith.addf %196, %198 : vector<16x64xf32>
      %cst_70 = arith.constant 0.000000e+00 : f32
      %200 = vector.broadcast %cst_70 : f32 to vector<16x64xf32>
      %201 = arith.maximumf %199, %200 : vector<16x64xf32>
      %202 = arith.truncf %201 : vector<16x64xf32> to vector<16x64xbf16>
      %c0_71 = arith.constant 0 : index
      %c0_72 = arith.constant 0 : index
      %203 = vector.load %arg11[%c0_71, %c0_72] : memref<64x128xbf16, #tpu.memory_space<vmem>>, vector<64x128xbf16>
      %cst_73 = arith.constant dense<0.000000e+00> : vector<16x128xf32>
      %204 = tpu.matmul %202, %203, %cst_73 {dimension_numbers = #tpu.dot_dimension_numbers<[1], [0], [0], [1], [0, 0, 1, 1], [], []>} : vector<16x64xbf16>, vector<64x128xbf16>, vector<16x128xf32> -> vector<16x128xf32>
      %c0_74 = arith.constant 0 : index
      %c0_75 = arith.constant 0 : index
      %205 = vector.load %arg12[%c0_74, %c0_75] : memref<1x128xf32, #tpu.memory_space<vmem>>, vector<1x128xf32>
      %206 = vector.broadcast %205 : vector<1x128xf32> to vector<16x128xf32>
      %207 = arith.addf %204, %206 : vector<16x128xf32>
      %cst_76 = arith.constant dense<0xFF800000> : vector<16xf32>
      %208 = vector.multi_reduction <maximumf>, %207, %cst_76 [1] : vector<16x128xf32> to vector<16xf32>
      %209 = vector.shape_cast %208 : vector<16xf32> to vector<16x1xf32>
      %210 = vector.broadcast %209 : vector<16x1xf32> to vector<16x128xf32>
      %211 = arith.subf %207, %210 : vector<16x128xf32>
      %212 = math.exp %211 : vector<16x128xf32>
      %cst_77 = arith.constant dense<0.000000e+00> : vector<16xf32>
      %213 = vector.multi_reduction <add>, %212, %cst_77 [1] : vector<16x128xf32> to vector<16xf32>
      %214 = vector.shape_cast %213 : vector<16xf32> to vector<16x1xf32>
      %215 = math.log %214 : vector<16x1xf32>
      %216 = vector.broadcast %215 : vector<16x1xf32> to vector<16x128xf32>
      %217 = arith.subf %211, %216 : vector<16x128xf32>
      %c0_78 = arith.constant 0 : index
      %c0_79 = arith.constant 0 : index
      %218 = vector.load %arg13[%c0_78, %c0_79] : memref<16x128xf32, #tpu.memory_space<vmem>>, vector<16x128xf32>
      tpu.vector_store %arg13[%c0_78, %c0_79], %217 {strides = array<i32>} : memref<16x128xf32, #tpu.memory_space<vmem>>, vector<16x128xf32>,
    } else {
    }
    return
  }
  func.func @transform_0(%arg0: i32) -> (i32, i32) {
    %c0_i32 = arith.constant 0 : i32
    %c0_i32_0 = arith.constant 0 : i32
    return %arg0, %c0_i32 : i32, i32
  }
  func.func @transform_1(%arg0: i32) -> (i32, i32) {
    %c0_i32 = arith.constant 0 : i32
    %c0_i32_0 = arith.constant 0 : i32
    %c0_i32_1 = arith.constant 0 : i32
    return %c0_i32, %c0_i32_0 : i32, i32
  }
  func.func @transform_2(%arg0: i32) -> (i32, i32) {
    %c0_i32 = arith.constant 0 : i32
    %c0_i32_0 = arith.constant 0 : i32
    %c0_i32_1 = arith.constant 0 : i32
    return %c0_i32, %c0_i32_0 : i32, i32
  }
  func.func @transform_3(%arg0: i32) -> (i32, i32) {
    %c0_i32 = arith.constant 0 : i32
    %c0_i32_0 = arith.constant 0 : i32
    %c0_i32_1 = arith.constant 0 : i32
    return %c0_i32, %c0_i32_0 : i32, i32
  }
  func.func @transform_4(%arg0: i32) -> (i32, i32) {
    %c0_i32 = arith.constant 0 : i32
    %c0_i32_0 = arith.constant 0 : i32
    %c0_i32_1 = arith.constant 0 : i32
    return %c0_i32, %c0_i32_0 : i32, i32
  }
  func.func @transform_5(%arg0: i32) -> (i32, i32) {
    %c0_i32 = arith.constant 0 : i32
    %c0_i32_0 = arith.constant 0 : i32
    %c0_i32_1 = arith.constant 0 : i32
    return %c0_i32, %c0_i32_0 : i32, i32
  }
  func.func @transform_6(%arg0: i32) -> (i32, i32) {
    %c0_i32 = arith.constant 0 : i32
    %c0_i32_0 = arith.constant 0 : i32
    %c0_i32_1 = arith.constant 0 : i32
    return %c0_i32, %c0_i32_0 : i32, i32
  }
  func.func @transform_7(%arg0: i32) -> (i32, i32) {
    %c0_i32 = arith.constant 0 : i32
    %c0_i32_0 = arith.constant 0 : i32
    %c0_i32_1 = arith.constant 0 : i32
    return %c0_i32, %c0_i32_0 : i32, i32
  }
  func.func @transform_8(%arg0: i32) -> (i32, i32) {
    %c0_i32 = arith.constant 0 : i32
    %c0_i32_0 = arith.constant 0 : i32
    %c0_i32_1 = arith.constant 0 : i32
    return %c0_i32, %c0_i32_0 : i32, i32
  }
  func.func @transform_9(%arg0: i32) -> (i32, i32) {
    %c0_i32 = arith.constant 0 : i32
    %c0_i32_0 = arith.constant 0 : i32
    %c0_i32_1 = arith.constant 0 : i32
    return %c0_i32, %c0_i32_0 : i32, i32
  }
  func.func @transform_10(%arg0: i32) -> (i32, i32) {
    %c0_i32 = arith.constant 0 : i32
    %c0_i32_0 = arith.constant 0 : i32
    %c0_i32_1 = arith.constant 0 : i32
    return %c0_i32, %c0_i32_0 : i32, i32
  }
  func.func @transform_11(%arg0: i32) -> (i32, i32) {
    %c0_i32 = arith.constant 0 : i32
    %c0_i32_0 = arith.constant 0 : i32
    %c0_i32_1 = arith.constant 0 : i32
    return %c0_i32, %c0_i32_0 : i32, i32
  }
  func.func @transform_12(%arg0: i32) -> (i32, i32) {
    %c0_i32 = arith.constant 0 : i32
    %c0_i32_0 = arith.constant 0 : i32
    %c0_i32_1 = arith.constant 0 : i32
    return %c0_i32, %c0_i32_0 : i32, i32
  }
  func.func @transform_13(%arg0: i32) -> (i32, i32) {
    %c0_i32 = arith.constant 0 : i32
    %c0_i32_0 = arith.constant 0 : i32
    %c0_i32_1 = arith.constant 0 : i32
    return %c0_i32, %c0_i32_0 : i32, i32
  }
  func.func @transform_14(%arg0: i32) -> (i32, i32) {
    %c0_i32 = arith.constant 0 : i32
    %c0_i32_0 = arith.constant 0 : i32
    %c0_i32_1 = arith.constant 0 : i32
    return %c0_i32, %c0_i32_0 : i32, i32
  }
}

</mosaic_0001>

<bundles_post_ra>
// kernel: lstm_agent_forward.1
= control target key start
LH: loop header
LB: loop body
LE: loop exit
PB: predicated region body
PF: predicated region fallthrough
CT: control target
= control target key end

     0   :  { %20 = vsyncpa [#allocation5], 0  ;;  %s1769_s29 = smov 0   ;;  %s2014_s0 = inlined_call_operand.vmem [shape: f32[16,256], index: 0, kind: input, shape index: {}]   ;;  %s2015_s1 = inlined_call_operand.vmem [shape: bf16[256,32], index: 1, kind: input, shape index: {}]   ;;  %s2016_s2 = inlined_call_operand.vmem [shape: f32[1,32], index: 2, kind: input, shape index: {}]   ;;  %s2017_s3 = inlined_call_operand.vmem [shape: bf16[32,128], index: 3, kind: input, shape index: {}]   ;;  %s2018_s4 = inlined_call_operand.vmem [shape: f32[32,128], index: 4, kind: input, shape index: {}]   ;;  %s2019_s5 = inlined_call_operand.vmem [shape: f32[1,128], index: 5, kind: input, shape index: {}]   ;;  %s2020_s6 = inlined_call_operand.vmem [shape: f32[2,32], index: 6, kind: input, shape index: {}, may-alias: {6,13}]   ;;  %s2021_s7 = inlined_call_operand.vmem [shape: f32[2,32], index: 7, kind: input, shape index: {}, may-alias: {7,14}]   ;;  %s2022_s8 = inlined_call_operand.vmem [shape: bf16[32,64], index: 8, kind: input, shape index: {}]   ;;  %s2023_s9 = inlined_call_operand.vmem [shape: f32[1,64], index: 9, kind: input, shape index: {}]   ;;  %s2024_s10 = inlined_call_operand.vmem [shape: bf16[64,128], index: 10, kind: input, shape index: {}]   ;;  %s2025_s11 = inlined_call_operand.vmem [shape: f32[1,128], index: 11, kind: input, shape index: {}]   ;;  %s2026_s12 = inlined_call_operand.hbm [shape: f32[16,128], index: 12, kind: output, shape index: {0}]   ;;  %s2027_s13 = inlined_call_operand.vmem [shape: f32[2,32], index: 13, kind: output, shape index: {1}, may-alias: {6,13}]   ;;  %s2028_s14 = inlined_call_operand.vmem [shape: f32[2,32], index: 14, kind: output, shape index: {2}, may-alias: {7,14}]  }
   0x1 LB: > { %s1775_s30 = sadd.s32 4294967295, %s1686_s29   ;;  %p1403_p0 = scmp.ge.s32.totalorder %s1686_s29, 1  ;;  %s1686_s29 = sphi %s1769_s29, %s26_s29  }
   0x2   : > { %p403_p1 = scmp.lt.s32.totalorder %s1686_s29, 3 }
   0x4   : > { %p404_p2 = pnand %p1403_p0, %p403_p1 }
   0x5   : > { %p444_p3 = scmp.lt.s32.totalorder (!%p404_p2), %s1775_s30, 1  ;;  %s1479_s18 = sshll.u32 (!%p404_p2), %s1775_s30, 3 }
   0x6   : > { %407 = sbr.rel (%p404_p2) target bundleno = 5684 (0x1634), region = 68  ;;  %p1480_p4 = scmp.ne.s32.totalorder (!%p404_p2), %s1775_s30, 1 }
   0xb   : > { %v1535_v0 = vld [vmem:[%s2015_s1 + $0x38] sm:$0xff]  ;;  %v1534_v2 = vld [vmem:[%s2015_s1 + $0x30] sm:$0xff]  ;;  %v1533_v4 = vld [vmem:[%s2015_s1 + $0x28] sm:$0xff]  ;;  %s445_s21 = scalar_select %p444_p3, %s1775_s30, 1  ;;  %vm634_vm0 = vcmask 261120  }
   0xc   : > { %v1543_v1 = vld [vmem:[%s2015_s1 + $0x78] sm:$0xff]  ;;  %586 = vmatpush.bf16.msra.mxu0 %v1535_v0  ;;  %v1542_v3 = vld [vmem:[%s2015_s1 + $0x70] sm:$0xff]  ;;  %v1541_v5 = vld [vmem:[%s2015_s1 + $0x68] sm:$0xff]  ;;  %s1688_s16 = smov (!%p1480_p4), 64   ;;  %s1690_s24 = smov (!%p1480_p4), 96  }
   0xd   : > { %599 = vmatpush.bf16.msra.mxu1 %v1543_v1  ;;  %v1532_v6 = vld [vmem:[%s2015_s1 + $0x20] sm:$0xff]  ;;  %v1531_v8 = vld [vmem:[%s2015_s1 + $0x18] sm:$0xff]  ;;  %v1530_v10 = vld [vmem:[%s2015_s1 + $0x10] sm:$0xff]  ;;  %s1527_s26 = sshll.u32 %s445_s21, 4 }
   0xe   : > { %v1540_v7 = vld [vmem:[%s2015_s1 + $0x60] sm:$0xff]  ;;  %v1539_v9 = vld [vmem:[%s2015_s1 + $0x58] sm:$0xff]  ;;  %v1538_v11 = vld [vmem:[%s2015_s1 + $0x50] sm:$0xff]  ;;  %s448_s19 = scalar_lea.vmem %s2014_s0, %s1527_s26 }
   0xf   : > { %v1529_v12 = vld [vmem:[%s2015_s1 + $0x8] sm:$0xff]  ;;  %v1528_v14 = vld [vmem:[%s2015_s1] sm:$0xff] }
  0x10   : > { %587 = vmatpush.bf16.msra.mxu0 %v1534_v2  ;;  %v1537_v13 = vld [vmem:[%s2015_s1 + $0x48] sm:$0xff]  ;;  %v1536_v15 = vld [vmem:[%s2015_s1 + $0x40] sm:$0xff] }
  0x11   : > { %600 = vmatpush.bf16.msra.mxu1 %v1542_v3  ;;  %v450_v16 = vld [vmem:[%s448_s19] sm:$0xff]  ;;  %v451_v17 = vld [vmem:[%s448_s19 + $0x8] sm:$0xff]  ;;  %s652_s19 = scalar_lea.vmem [#allocation2], %s1479_s18 }
  0x12   : > { %v452_v18 = vpack.c.bf16 %v450_v16, %v450_v16  ;;  %v453_v19 = vpack.c.bf16 %v451_v17, %v451_v17  ;;  %v1545_v20 = vld [vmem:[%s2017_s3 + $0x8] sm:$0xff]  ;;  %v1544_v21 = vld [vmem:[%s2017_s3] sm:$0xff] }
  0x13   : > { %644 = vmatpush.bf16.msra.mxu2 %v1545_v20  ;;  %v1572_v22 = vld [vmem:[%s2016_s2] ss:$0 sm:$0xff] }
  0x14   : > { %588 = vmatpush.bf16.msra.mxu0 %v1533_v4  ;;  %v1573_v31 = vld [vmem:[%s2019_s5] ss:$0 sm:$0xff] }
  0x15   : > { %601 = vmatpush.bf16.msra.mxu1 %v1541_v5 }
  0x17   : > { %645 = vmatpush.bf16.msra.mxu2 %v1544_v21 }
  0x18   : > { %589 = vmatpush.bf16.msra.mxu0 %v1532_v6 }
  0x19   : > { %602 = vmatpush.bf16.msra.mxu1 %v1540_v7 }
  0x1c   : > { %590 = vmatpush.bf16.msra.mxu0 %v1531_v8 }
  0x1d   : > { %603 = vmatpush.bf16.msra.mxu1 %v1539_v9 }
  0x20   : > { %591 = vmatpush.bf16.msra.mxu0 %v1530_v10 }
  0x21   : > { %604 = vmatpush.bf16.msra.mxu1 %v1538_v11 }
  0x24   : > { %592 = vmatpush.bf16.msra.mxu0 %v1529_v12 }
  0x25   : > { %605 = vmatpush.bf16.msra.mxu1 %v1537_v13 }
  0x28   : > { %593 = vmatpush.bf16.msra.mxu0 %v1528_v14 }
  0x29   : > { %606 = vmatpush.bf16.msra.mxu1 %v1536_v15 }
  0x2b   : > { %594 = vmatmul.bf16.vlgmr.msra.gmra.mxu0 %v452_v18 }
  0x2c   : > { %607 = vmatmul.bf16.vlgmr.msra.gmra.mxu1 %v453_v19 }
  0xa8   : > { %v595_v23 = vpop.f32.mrf.mxu0 }
  0xa9   : > { %v608_v24 = vpop.f32.mrf.mxu1  ;;  %v596_v25 = vadd.f32 %v1572_v22, %v595_v23 }
  0xab   : > { %v609_v26 = vadd.f32 %v608_v24, %v596_v25 }
  0xad   : > { %v612_v27 = vmax.f32 %v609_v26, 0.0 }
  0xaf   : > { %v613_v28 = vpack.c.bf16 %v612_v27, %v612_v27 }
  0xb0   : > { %v597_v29 = vpop.f32.mrf.mxu0 }
  0xb1   : > { %v610_v30 = vpop.f32.mrf.mxu1  ;;  %1478 = vmatmul.msk.bf16.vlgmr.msra.gmra.mxu2 %vm634_vm0, %v613_v28 }
 0x134   : > { %v647_v32 = vpop.f32.mrf.mxu2 }
 0x135   : > { %v648_v33 = vadd.f32 %v1573_v31, %v647_v32 }
 0x137   : > { %653 = vst [vmem:[%s652_s19] sm:$0xff] %v648_v33  ;;  %s1689_s19 = smov (!%p1480_p4), 32  }
 0x138   : > { %657 = sbr.rel (%p1480_p4) target bundleno = 5678 (0x162e), region = 72 }
 0x13c   : > { %v649_v34 = vpop.f32.mrf.mxu2 }
 0x13d   : > { %v1850_v35 = vld [vmem:[%s2018_s4 + $0x18] sm:$0xff]  ;;  %v1855_v36 = vld [vmem:[%s2018_s4 + $0x10] sm:$0xff]  ;;  %v1862_v37 = vld [vmem:[%s2018_s4 + $0x8] sm:$0xff]  ;;  %v662_v46 = vlaneseq  ;;  %vm740_vm8 = vcmask 254976  }
 0x13e   : > { %685 = vmatpush.msra.mxu3 %v1850_v35  ;;  %757 = vmatpush.msra.mxu2 %v1850_v35  ;;  %v1871_v38 = vld [vmem:[%s2018_s4] sm:$0xff]  ;;  %v1547_v54 = vld [vmem:[%s2022_s8 + $0x8] sm:$0xff] }
 0x13f   : > { %958 = vmatpush.msra.mxu0 %v1850_v35  ;;  %1025 = vmatpush.msra.mxu1 %v1850_v35  ;;  %v667_v39 = vld [vmem:[%s2020_s6] sm:$0x3]  ;;  %v663_v48 = vand.u32 127, %v662_v46  ;;  %v742_v8 = vld [vmem:[#allocation2 + $0x2] sm:$0x3] }
 0x140   : > { %686 = vmatpush.msra.mxu3 %v1855_v36  ;;  %758 = vmatpush.msra.mxu2 %v1855_v36  ;;  %v669_v40 = vld [vmem:[#allocation2] sm:$0x3] }
 0x141   : > { %959 = vmatpush.msra.mxu0 %v1855_v36  ;;  %1026 = vmatpush.msra.mxu1 %v1855_v36  ;;  %vm664_vm1 = vcmp.ge.s32.totalorder %v663_v48, 64  ;;  %vm665_vm2 = vcmp.lt.s32.totalorder %v663_v48, 96  ;;  %v668_v61 = vld [vmem:[%s2021_s7] sm:$0x3] }
 0x142   : > { %687 = vmatpush.msra.mxu3 %v1862_v37  ;;  %759 = vmatpush.msra.mxu2 %v1862_v37  ;;  %vm1899_vm4 = vmand %vm664_vm1, %vm665_vm2 }
 0x143   : > { %960 = vmatpush.msra.mxu0 %v1862_v37  ;;  %1027 = vmatpush.msra.mxu1 %v1862_v37 }
 0x144   : > { %688 = vmatpush.msra.mxu3 %v1871_v38  ;;  %760 = vmatpush.msra.mxu2 %v1871_v38 }
 0x145   : > { %1481 = vmatmul.msk.f32.vlgmr.msra.gmra.mxu3 %vm634_vm0, %v667_v39  ;;  %961 = vmatpush.msra.mxu0 %v1871_v38 }
 0x146   : > { %824 = vmatpush.msrb.mxu2 %v1850_v35  ;;  %891 = vmatpush.msrb.mxu3 %v1850_v35 }
 0x147   : > { %1028 = vmatpush.msra.mxu1 %v1871_v38  ;;  %1249 = vmatpush.bf16.msrb.mxu0 %v1547_v54 }
 0x148   : > { %825 = vmatpush.msrb.mxu2 %v1855_v36  ;;  %892 = vmatpush.msrb.mxu3 %v1855_v36 }
 0x14a   : > { %826 = vmatpush.msrb.mxu2 %v1862_v37  ;;  %893 = vmatpush.msrb.mxu3 %v1862_v37 }
 0x14c   : > { %827 = vmatpush.msrb.mxu2 %v1871_v38  ;;  %894 = vmatpush.msrb.mxu3 %v1871_v38 }
 0x14e   : > { %1159 = vmatpush.msra.mxu3 %v1850_v35 }
 0x150   : > { %1160 = vmatpush.msra.mxu3 %v1855_v36 }
 0x152   : > { %1161 = vmatpush.msra.mxu3 %v1862_v37 }
 0x154   : > { %1162 = vmatpush.msra.mxu3 %v1871_v38 }
 0x1c8   : > { %v690_v41 = vpop.f32.mrf.mxu3 }
 0x1c9   : > { %v693_v42 = vadd.f32 %v690_v41, %v669_v40 }
 0x1cb   : > { %v1482_v43 = vmul.f32 -1.442695, %v693_v42 }
 0x1cd   : > { %1576 = vpow2.f32 %v1482_v43 }
 0x1d3   : > { %v1577_v44 = vpop.eup %1576 }
 0x1d4   : > { %v697_v45 = vadd.f32 1.0, %v1577_v44 }
 0x1d6   : > { %1578 = vrcp.f32 %v697_v45  ;;  %v709_v51 = vand.u32 2147483648, %v697_v45  ;;  %v707_v53 = vand.u32 2147483647, %v697_v45  ;;  %vm703_vm5 = vweird.f32 %v697_v45 }
 0x1d7   : > { %1580 = vtanh.f32 %v693_v42 }
 0x1d8   : > { %v710_v56 = vor.u32 1.1754944e-38, %v709_v51  ;;  %vm708_vm7 = vcmp.eq.f32.partialorder %v707_v53, 8.507059e+37 }
 0x1dc   : > { %v1579_v47 = vpop.eup %1578 }
 0x1dd   : > { %v699_v49 = vmul.f32 %v1579_v47, %v697_v45  ;;  %vm704_vm3 = vweird.f32 %v1579_v47  ;;  %v1581_v58 = vpop.eup %1580 }
 0x1de   : > { %vm705_vm6 = vmor %vm703_vm5, %vm704_vm3 }
 0x1df   : > { %v700_v50 = vsub.f32 1.0, %v699_v49 }
 0x1e1   : > { %v701_v52 = vmul.f32 %v1579_v47, %v700_v50 }
 0x1e3   : > { %v702_v55 = vadd.f32 %v1579_v47, %v701_v52 }
 0x1e5   : > { %v706_v57 = vsel %vm705_vm6, %v1579_v47, %v702_v55 }
 0x1e6   : > { %v711_v59 = vsel %vm708_vm7, %v710_v56, %v706_v57 }
 0x1e7   : > { %v714_v60 = vsel %vm1899_vm4, %v1581_v58, %v711_v59 }
 0x1e8   : > { %721 = vrot.lane.b32.xlu0 %v714_v60, %s1688_s16 }
 0x1f0   : > { %716 = vrot.lane.b32.xlu0 %v668_v61, %s1689_s19 }
 0x25a   : > { %v722_v62 = vpop.permute.xlu0 %721 }
 0x25b   : > { %v724_v63 = vmul.f32 %v722_v62, %v714_v60 }
 0x25d   : > { %726 = vrot.lane.b32.xlu1 %v724_v63, %s1689_s19  ;;  %v876_v63 = vld [vmem:[#allocation2 + $0x6] sm:$0x3] }
 0x262   : > { %v717_v0 = vpop.permute.xlu0 %716 }
 0x263   : > { %v719_v1 = vmul.f32 %v717_v0, %v714_v60 }
 0x2cf   : > { %v727_v2 = vpop.permute.xlu1 %726 }
 0x2d0   : > { %v729_v3 = vadd.f32 %v727_v2, %v719_v1 }
 0x2d2   : > { %1582 = vtanh.f32 %v729_v3 }
 0x2d8   : > { %v1583_v4 = vpop.eup %1582 }
 0x2d9   : > { %732 = vrot.lane.b32.xlu1 %v1583_v4, %s1688_s16 }
 0x34b   : > { %v733_v5 = vpop.permute.xlu1 %732 }
 0x34c   : > { %v735_v6 = vmul.f32 %v733_v5, %v714_v60 }
 0x34e   : > { %737 = vrot.lane.b32.xlu2 %v735_v6, %s1689_s19 }
 0x3a8   : > { %v738_v7 = vpop.permute.xlu2 %737 }
 0x3a9   : > { %741 = vst.msk [vmem:[#allocation3] sm:$0x3] %vm740_vm8, %v738_v7  ;;  %1483 = vmatmul.msk.f32.vlgmr.msra.gmra.mxu2 %vm634_vm0, %v738_v7 }
 0x3aa   : > { %1092 = vmatpush.msra.mxu2 %v1850_v35  ;;  %v809_v35 = vld [vmem:[#allocation2 + $0x4] sm:$0x3] }
 0x3ac   : > { %1093 = vmatpush.msra.mxu2 %v1855_v36 }
 0x3ae   : > { %1094 = vmatpush.msra.mxu2 %v1862_v37 }
 0x3b0   : > { %1095 = vmatpush.msra.mxu2 %v1871_v38 }
 0x42c   : > { %v762_v9 = vpop.f32.mrf.mxu2 }
 0x42d   : > { %v765_v10 = vadd.f32 %v762_v9, %v742_v8 }
 0x42f   : > { %v1484_v11 = vmul.f32 -1.442695, %v765_v10 }
 0x431   : > { %1584 = vpow2.f32 %v1484_v11 }
 0x437   : > { %v1585_v12 = vpop.eup %1584 }
 0x438   : > { %v769_v13 = vadd.f32 1.0, %v1585_v12 }
 0x43a   : > { %1586 = vrcp.f32 %v769_v13  ;;  %v781_v17 = vand.u32 2147483648, %v769_v13  ;;  %v779_v19 = vand.u32 2147483647, %v769_v13  ;;  %vm775_vm10 = vweird.f32 %v769_v13 }
 0x43b   : > { %1588 = vtanh.f32 %v765_v10 }
 0x43c   : > { %v782_v21 = vor.u32 1.1754944e-38, %v781_v17  ;;  %vm780_vm12 = vcmp.eq.f32.partialorder %v779_v19, 8.507059e+37 }
 0x440   : > { %v1587_v14 = vpop.eup %1586 }
 0x441   : > { %v771_v15 = vmul.f32 %v1587_v14, %v769_v13  ;;  %vm776_vm9 = vweird.f32 %v1587_v14  ;;  %v1589_v23 = vpop.eup %1588 }
 0x442   : > { %vm777_vm11 = vmor %vm775_vm10, %vm776_vm9 }
 0x443   : > { %v772_v16 = vsub.f32 1.0, %v771_v15 }
 0x445   : > { %v773_v18 = vmul.f32 %v1587_v14, %v772_v16 }
 0x447   : > { %v774_v20 = vadd.f32 %v1587_v14, %v773_v18 }
 0x449   : > { %v778_v22 = vsel %vm777_vm11, %v1587_v14, %v774_v20 }
 0x44a   : > { %v783_v24 = vsel %vm780_vm12, %v782_v21, %v778_v22 }
 0x44b   : > { %v786_v25 = vsel %vm1899_vm4, %v1589_v23, %v783_v24 }
 0x44c   : > { %789 = vrot.lane.b32.xlu2 %v786_v25, %s1688_s16  ;;  %v787_v28 = vmul.f32 %v786_v25, %v729_v3 }
 0x4a6   : > { %v790_v26 = vpop.permute.xlu2 %789 }
 0x4a7   : > { %v792_v27 = vmul.f32 %v790_v26, %v786_v25  ;;  %v943_v26 = vld [vmem:[#allocation2 + $0x8] sm:$0x3] }
 0x4a9   : > { %794 = vrot.lane.b32.xlu0 %v792_v27, %s1689_s19 }
 0x51b   : > { %v795_v29 = vpop.permute.xlu0 %794 }
 0x51c   : > { %v797_v30 = vadd.f32 %v795_v29, %v787_v28 }
 0x51e   : > { %1590 = vtanh.f32 %v797_v30 }
 0x524   : > { %v1591_v31 = vpop.eup %1590 }
 0x525   : > { %800 = vrot.lane.b32.xlu1 %v1591_v31, %s1688_s16 }
 0x597   : > { %v801_v32 = vpop.permute.xlu1 %800 }
 0x598   : > { %v803_v33 = vmul.f32 %v801_v32, %v786_v25 }
 0x59a   : > { %805 = vrot.lane.b32.xlu2 %v803_v33, %s1689_s19 }
 0x5f4   : > { %v806_v34 = vpop.permute.xlu2 %805 }
 0x5f5   : > { %808 = vst.msk [vmem:[#allocation3 + $0x2] sm:$0x3] %vm740_vm8, %v806_v34  ;;  %1485 = vmatmul.msk.f32.vlgmr.msrb.gmra.mxu2 %vm634_vm0, %v806_v34 }
 0x678   : > { %v829_v36 = vpop.f32.mrf.mxu2 }
 0x679   : > { %v832_v37 = vadd.f32 %v829_v36, %v809_v35 }
 0x67b   : > { %v1486_v38 = vmul.f32 -1.442695, %v832_v37 }
 0x67d   : > { %1592 = vpow2.f32 %v1486_v38 }
 0x683   : > { %v1593_v39 = vpop.eup %1592 }
 0x684   : > { %v836_v40 = vadd.f32 1.0, %v1593_v39 }
 0x686   : > { %1594 = vrcp.f32 %v836_v40  ;;  %v848_v44 = vand.u32 2147483648, %v836_v40  ;;  %v846_v46 = vand.u32 2147483647, %v836_v40  ;;  %vm842_vm14 = vweird.f32 %v836_v40 }
 0x687   : > { %1596 = vtanh.f32 %v832_v37 }
 0x688   : > { %v849_v48 = vor.u32 1.1754944e-38, %v848_v44  ;;  %vm847_vm1 = vcmp.eq.f32.partialorder %v846_v46, 8.507059e+37 }
 0x68c   : > { %v1595_v41 = vpop.eup %1594 }
 0x68d   : > { %v838_v42 = vmul.f32 %v1595_v41, %v836_v40  ;;  %vm843_vm13 = vweird.f32 %v1595_v41  ;;  %v1597_v50 = vpop.eup %1596 }
 0x68e   : > { %vm844_vm15 = vmor %vm842_vm14, %vm843_vm13 }
 0x68f   : > { %v839_v43 = vsub.f32 1.0, %v838_v42 }
 0x691   : > { %v840_v45 = vmul.f32 %v1595_v41, %v839_v43 }
 0x693   : > { %v841_v47 = vadd.f32 %v1595_v41, %v840_v45 }
 0x695   : > { %v845_v49 = vsel %vm844_vm15, %v1595_v41, %v841_v47 }
 0x696   : > { %v850_v51 = vsel %vm847_vm1, %v849_v48, %v845_v49 }
 0x697   : > { %v853_v52 = vsel %vm1899_vm4, %v1597_v50, %v850_v51 }
 0x698   : > { %856 = vrot.lane.b32.xlu0 %v853_v52, %s1688_s16  ;;  %v854_v56 = vmul.f32 %v853_v52, %v797_v30 }
 0x70a   : > { %v857_v53 = vpop.permute.xlu0 %856 }
 0x70b   : > { %v859_v55 = vmul.f32 %v857_v53, %v853_v52  ;;  %v1010_v53 = vld [vmem:[#allocation2 + $0xa] sm:$0x3] }
 0x70d   : > { %861 = vrot.lane.b32.xlu1 %v859_v55, %s1689_s19 }
 0x77f   : > { %v862_v57 = vpop.permute.xlu1 %861 }
 0x780   : > { %v864_v58 = vadd.f32 %v862_v57, %v854_v56 }
 0x782   : > { %1598 = vtanh.f32 %v864_v58 }
 0x788   : > { %v1599_v59 = vpop.eup %1598 }
 0x789   : > { %867 = vrot.lane.b32.xlu2 %v1599_v59, %s1688_s16 }
 0x7e3   : > { %v868_v60 = vpop.permute.xlu2 %867 }
 0x7e4   : > { %v870_v61 = vmul.f32 %v868_v60, %v853_v52 }
 0x7e6   : > { %872 = vrot.lane.b32.xlu0 %v870_v61, %s1689_s19 }
 0x858   : > { %v873_v62 = vpop.permute.xlu0 %872 }
 0x859   : > { %875 = vst.msk [vmem:[#allocation3 + $0x4] sm:$0x3] %vm740_vm8, %v873_v62  ;;  %1487 = vmatmul.msk.f32.vlgmr.msrb.gmra.mxu3 %vm634_vm0, %v873_v62 }
 0x8dc   : > { %v896_v0 = vpop.f32.mrf.mxu3 }
 0x8dd   : > { %v899_v1 = vadd.f32 %v896_v0, %v876_v63 }
 0x8df   : > { %v1488_v2 = vmul.f32 -1.442695, %v899_v1 }
 0x8e1   : > { %1600 = vpow2.f32 %v1488_v2 }
 0x8e7   : > { %v1601_v3 = vpop.eup %1600 }
 0x8e8   : > { %v903_v4 = vadd.f32 1.0, %v1601_v3 }
 0x8ea   : > { %1602 = vrcp.f32 %v903_v4  ;;  %v915_v8 = vand.u32 2147483648, %v903_v4  ;;  %v913_v10 = vand.u32 2147483647, %v903_v4  ;;  %vm909_vm3 = vweird.f32 %v903_v4 }
 0x8eb   : > { %1604 = vtanh.f32 %v899_v1 }
 0x8ec   : > { %v916_v12 = vor.u32 1.1754944e-38, %v915_v8  ;;  %vm914_vm6 = vcmp.eq.f32.partialorder %v913_v10, 8.507059e+37 }
 0x8f0   : > { %v1603_v5 = vpop.eup %1602 }
 0x8f1   : > { %v905_v6 = vmul.f32 %v1603_v5, %v903_v4  ;;  %vm910_vm2 = vweird.f32 %v1603_v5  ;;  %v1605_v14 = vpop.eup %1604 }
 0x8f2   : > { %vm911_vm5 = vmor %vm909_vm3, %vm910_vm2 }
 0x8f3   : > { %v906_v7 = vsub.f32 1.0, %v905_v6 }
 0x8f5   : > { %v907_v9 = vmul.f32 %v1603_v5, %v906_v7 }
 0x8f7   : > { %v908_v11 = vadd.f32 %v1603_v5, %v907_v9 }
 0x8f9   : > { %v912_v13 = vsel %vm911_vm5, %v1603_v5, %v908_v11 }
 0x8fa   : > { %v917_v15 = vsel %vm914_vm6, %v916_v12, %v912_v13 }
 0x8fb   : > { %v920_v16 = vsel %vm1899_vm4, %v1605_v14, %v917_v15 }
 0x8fc   : > { %923 = vrot.lane.b32.xlu1 %v920_v16, %s1688_s16  ;;  %v921_v19 = vmul.f32 %v920_v16, %v864_v58 }
 0x96e   : > { %v924_v17 = vpop.permute.xlu1 %923 }
 0x96f   : > { %v926_v18 = vmul.f32 %v924_v17, %v920_v16  ;;  %v1077_v17 = vld [vmem:[#allocation2 + $0xc] sm:$0x3] }
 0x971   : > { %928 = vrot.lane.b32.xlu2 %v926_v18, %s1689_s19 }
 0x9cb   : > { %v929_v20 = vpop.permute.xlu2 %928 }
 0x9cc   : > { %v931_v21 = vadd.f32 %v929_v20, %v921_v19 }
 0x9ce   : > { %1606 = vtanh.f32 %v931_v21 }
 0x9d4   : > { %v1607_v22 = vpop.eup %1606 }
 0x9d5   : > { %934 = vrot.lane.b32.xlu0 %v1607_v22, %s1688_s16 }
 0xa47   : > { %v935_v23 = vpop.permute.xlu0 %934 }
 0xa48   : > { %v937_v24 = vmul.f32 %v935_v23, %v920_v16 }
 0xa4a   : > { %939 = vrot.lane.b32.xlu1 %v937_v24, %s1689_s19 }
 0xabc   : > { %v940_v25 = vpop.permute.xlu1 %939 }
 0xabd   : > { %942 = vst.msk [vmem:[#allocation3 + $0x6] sm:$0x3] %vm740_vm8, %v940_v25  ;;  %1489 = vmatmul.msk.f32.vlgmr.msra.gmra.mxu0 %vm634_vm0, %v940_v25 }
 0xb3a   : > { %v963_v27 = vpop.f32.mrf.mxu0 }
 0xb3b   : > { %v966_v28 = vadd.f32 %v963_v27, %v943_v26 }
 0xb3d   : > { %v1490_v29 = vmul.f32 -1.442695, %v966_v28 }
 0xb3f   : > { %1608 = vpow2.f32 %v1490_v29 }
 0xb45   : > { %v1609_v30 = vpop.eup %1608 }
 0xb46   : > { %v970_v31 = vadd.f32 1.0, %v1609_v30 }
 0xb48   : > { %1610 = vrcp.f32 %v970_v31  ;;  %v982_v35 = vand.u32 2147483648, %v970_v31  ;;  %v980_v37 = vand.u32 2147483647, %v970_v31  ;;  %vm976_vm9 = vweird.f32 %v970_v31 }
 0xb49   : > { %1612 = vtanh.f32 %v966_v28 }
 0xb4a   : > { %v983_v39 = vor.u32 1.1754944e-38, %v982_v35  ;;  %vm981_vm11 = vcmp.eq.f32.partialorder %v980_v37, 8.507059e+37 }
 0xb4e   : > { %v1611_v32 = vpop.eup %1610 }
 0xb4f   : > { %v972_v33 = vmul.f32 %v1611_v32, %v970_v31  ;;  %vm977_vm7 = vweird.f32 %v1611_v32  ;;  %v1613_v41 = vpop.eup %1612 }
 0xb50   : > { %vm978_vm10 = vmor %vm976_vm9, %vm977_vm7 }
 0xb51   : > { %v973_v34 = vsub.f32 1.0, %v972_v33 }
 0xb53   : > { %v974_v36 = vmul.f32 %v1611_v32, %v973_v34 }
 0xb55   : > { %v975_v38 = vadd.f32 %v1611_v32, %v974_v36 }
 0xb57   : > { %v979_v40 = vsel %vm978_vm10, %v1611_v32, %v975_v38 }
 0xb58   : > { %v984_v42 = vsel %vm981_vm11, %v983_v39, %v979_v40 }
 0xb59   : > { %v987_v43 = vsel %vm1899_vm4, %v1613_v41, %v984_v42 }
 0xb5a   : > { %990 = vrot.lane.b32.xlu2 %v987_v43, %s1688_s16  ;;  %v988_v46 = vmul.f32 %v987_v43, %v931_v21 }
 0xbb4   : > { %v991_v44 = vpop.permute.xlu2 %990 }
 0xbb5   : > { %v993_v45 = vmul.f32 %v991_v44, %v987_v43  ;;  %v1144_v44 = vld [vmem:[#allocation2 + $0xe] sm:$0x3] }
 0xbb7   : > { %995 = vrot.lane.b32.xlu0 %v993_v45, %s1689_s19 }
 0xc29   : > { %v996_v47 = vpop.permute.xlu0 %995 }
 0xc2a   : > { %v998_v48 = vadd.f32 %v996_v47, %v988_v46 }
 0xc2c   : > { %1614 = vtanh.f32 %v998_v48 }
 0xc32   : > { %v1615_v49 = vpop.eup %1614 }
 0xc33   : > { %1001 = vrot.lane.b32.xlu1 %v1615_v49, %s1688_s16 }
 0xca5   : > { %v1002_v50 = vpop.permute.xlu1 %1001 }
 0xca6   : > { %v1004_v51 = vmul.f32 %v1002_v50, %v987_v43 }
 0xca8   : > { %1006 = vrot.lane.b32.xlu2 %v1004_v51, %s1689_s19 }
 0xd02   : > { %v1007_v52 = vpop.permute.xlu2 %1006 }
 0xd03   : > { %1009 = vst.msk [vmem:[#allocation3 + $0x8] sm:$0x3] %vm740_vm8, %v1007_v52  ;;  %1491 = vmatmul.msk.f32.vlgmr.msra.gmra.mxu1 %vm634_vm0, %v1007_v52 }
 0xd80   : > { %v1030_v55 = vpop.f32.mrf.mxu1 }
 0xd81   : > { %v1033_v56 = vadd.f32 %v1030_v55, %v1010_v53 }
 0xd83   : > { %v1492_v57 = vmul.f32 -1.442695, %v1033_v56 }
 0xd85   : > { %1616 = vpow2.f32 %v1492_v57 }
 0xd8b   : > { %v1617_v58 = vpop.eup %1616 }
 0xd8c   : > { %v1037_v59 = vadd.f32 1.0, %v1617_v58 }
 0xd8e   : > { %1618 = vrcp.f32 %v1037_v59  ;;  %v1049_v63 = vand.u32 2147483648, %v1037_v59  ;;  %v1047_v1 = vand.u32 2147483647, %v1037_v59  ;;  %vm1043_vm13 = vweird.f32 %v1037_v59 }
 0xd8f   : > { %1620 = vtanh.f32 %v1033_v56 }
 0xd90   : > { %v1050_v3 = vor.u32 1.1754944e-38, %v1049_v63  ;;  %vm1048_vm15 = vcmp.eq.f32.partialorder %v1047_v1, 8.507059e+37 }
 0xd94   : > { %v1619_v60 = vpop.eup %1618 }
 0xd95   : > { %v1039_v61 = vmul.f32 %v1619_v60, %v1037_v59  ;;  %vm1044_vm12 = vweird.f32 %v1619_v60  ;;  %v1621_v5 = vpop.eup %1620 }
 0xd96   : > { %vm1045_vm14 = vmor %vm1043_vm13, %vm1044_vm12 }
 0xd97   : > { %v1040_v62 = vsub.f32 1.0, %v1039_v61 }
 0xd99   : > { %v1041_v0 = vmul.f32 %v1619_v60, %v1040_v62 }
 0xd9b   : > { %v1042_v2 = vadd.f32 %v1619_v60, %v1041_v0 }
 0xd9d   : > { %v1046_v4 = vsel %vm1045_vm14, %v1619_v60, %v1042_v2 }
 0xd9e   : > { %v1051_v6 = vsel %vm1048_vm15, %v1050_v3, %v1046_v4 }
 0xd9f   : > { %v1054_v7 = vsel %vm1899_vm4, %v1621_v5, %v1051_v6 }
 0xda0   : > { %1057 = vrot.lane.b32.xlu0 %v1054_v7, %s1688_s16  ;;  %v1055_v10 = vmul.f32 %v1054_v7, %v998_v48 }
 0xe12   : > { %v1058_v8 = vpop.permute.xlu0 %1057 }
 0xe13   : > { %v1060_v9 = vmul.f32 %v1058_v8, %v1054_v7 }
 0xe15   : > { %1062 = vrot.lane.b32.xlu1 %v1060_v9, %s1689_s19  ;;  %v1217_v9 = vld [vmem:[#allocation3] sm:$0xff] }
 0xe87   : > { %v1063_v11 = vpop.permute.xlu1 %1062 }
 0xe88   : > { %v1065_v12 = vadd.f32 %v1063_v11, %v1055_v10 }
 0xe8a   : > { %1622 = vtanh.f32 %v1065_v12 }
 0xe90   : > { %v1623_v13 = vpop.eup %1622 }
 0xe91   : > { %1068 = vrot.lane.b32.xlu2 %v1623_v13, %s1688_s16  ;;  %v1550_v13 = vld [vmem:[%s2024_s10 + $0x10] sm:$0xff] }
 0xeeb   : > { %v1069_v14 = vpop.permute.xlu2 %1068 }
 0xeec   : > { %v1071_v15 = vmul.f32 %v1069_v14, %v1054_v7  ;;  %v1546_v7 = vld [vmem:[%s2022_s8] sm:$0xff]  ;;  %v1549_v14 = vld [vmem:[%s2024_s10 + $0x8] sm:$0xff] }
 0xeed   : > { %1250 = vmatpush.bf16.msrb.mxu0 %v1546_v7 }
 0xeee   : > { %1073 = vrot.lane.b32.xlu0 %v1071_v15, %s1689_s19  ;;  %v1548_v15 = vld [vmem:[%s2024_s10] sm:$0xff] }
 0xf60   : > { %v1074_v16 = vpop.permute.xlu0 %1073 }
 0xf61   : > { %1076 = vst.msk [vmem:[#allocation3 + $0xa] sm:$0x3] %vm740_vm8, %v1074_v16  ;;  %1493 = vmatmul.msk.f32.vlgmr.msra.gmra.mxu2 %vm634_vm0, %v1074_v16 }
 0xfe4   : > { %v1097_v18 = vpop.f32.mrf.mxu2 }
 0xfe5   : > { %v1100_v19 = vadd.f32 %v1097_v18, %v1077_v17  ;;  %v1574_v17 = vld [vmem:[%s2023_s9] ss:$0 sm:$0xff] }
 0xfe7   : > { %v1494_v20 = vmul.f32 -1.442695, %v1100_v19 }
 0xfe9   : > { %1624 = vpow2.f32 %v1494_v20 }
 0xfef   : > { %v1625_v21 = vpop.eup %1624 }
 0xff0   : > { %v1104_v22 = vadd.f32 1.0, %v1625_v21 }
 0xff2   : > { %1626 = vrcp.f32 %v1104_v22  ;;  %v1116_v26 = vand.u32 2147483648, %v1104_v22  ;;  %v1114_v28 = vand.u32 2147483647, %v1104_v22  ;;  %vm1110_vm2 = vweird.f32 %v1104_v22 }
 0xff3   : > { %1628 = vtanh.f32 %v1100_v19 }
 0xff4   : > { %v1117_v30 = vor.u32 1.1754944e-38, %v1116_v26  ;;  %vm1115_vm5 = vcmp.eq.f32.partialorder %v1114_v28, 8.507059e+37 }
 0xff8   : > { %v1627_v23 = vpop.eup %1626 }
 0xff9   : > { %v1106_v24 = vmul.f32 %v1627_v23, %v1104_v22  ;;  %vm1111_vm1 = vweird.f32 %v1627_v23  ;;  %v1629_v32 = vpop.eup %1628 }
 0xffa   : > { %vm1112_vm3 = vmor %vm1110_vm2, %vm1111_vm1 }
 0xffb   : > { %v1107_v25 = vsub.f32 1.0, %v1106_v24  ;;  %v1575_v24 = vld [vmem:[%s2025_s11] ss:$0 sm:$0xff] }
 0xffd   : > { %v1108_v27 = vmul.f32 %v1627_v23, %v1107_v25 }
 0xfff   : > { %v1109_v29 = vadd.f32 %v1627_v23, %v1108_v27 }
0x1001   : > { %v1113_v31 = vsel %vm1112_vm3, %v1627_v23, %v1109_v29 }
0x1002   : > { %v1118_v33 = vsel %vm1115_vm5, %v1117_v30, %v1113_v31 }
0x1003   : > { %v1121_v34 = vsel %vm1899_vm4, %v1629_v32, %v1118_v33 }
0x1004   : > { %1124 = vrot.lane.b32.xlu1 %v1121_v34, %s1688_s16  ;;  %v1122_v37 = vmul.f32 %v1121_v34, %v1065_v12  ;;  %v1551_v12 = vld [vmem:[%s2024_s10 + $0x18] sm:$0xff] }
0x1005   : > { %1304 = vmatpush.bf16.msrb.mxu1 %v1551_v12 }
0x1009   : > { %1305 = vmatpush.bf16.msrb.mxu1 %v1550_v13 }
0x100d   : > { %1306 = vmatpush.bf16.msrb.mxu1 %v1549_v14 }
0x1011   : > { %1307 = vmatpush.bf16.msrb.mxu1 %v1548_v15 }
0x1076   : > { %v1125_v35 = vpop.permute.xlu1 %1124 }
0x1077   : > { %v1127_v36 = vmul.f32 %v1125_v35, %v1121_v34 }
0x1079   : > { %1129 = vrot.lane.b32.xlu2 %v1127_v36, %s1689_s19 }
0x10d3   : > { %v1130_v38 = vpop.permute.xlu2 %1129 }
0x10d4   : > { %v1132_v39 = vadd.f32 %v1130_v38, %v1122_v37 }
0x10d6   : > { %1630 = vtanh.f32 %v1132_v39 }
0x10dc   : > { %v1631_v40 = vpop.eup %1630 }
0x10dd   : > { %1135 = vrot.lane.b32.xlu0 %v1631_v40, %s1688_s16 }
0x114f   : > { %v1136_v41 = vpop.permute.xlu0 %1135 }
0x1150   : > { %v1138_v42 = vmul.f32 %v1136_v41, %v1121_v34 }
0x1152   : > { %1140 = vrot.lane.b32.xlu1 %v1138_v42, %s1689_s19 }
0x11c4   : > { %v1141_v43 = vpop.permute.xlu1 %1140 }
0x11c5   : > { %1143 = vst.msk [vmem:[#allocation3 + $0xc] sm:$0x3] %vm740_vm8, %v1141_v43  ;;  %1495 = vmatmul.msk.f32.vlgmr.msra.gmra.mxu3 %vm634_vm0, %v1141_v43 }
0x1248   : > { %v1164_v45 = vpop.f32.mrf.mxu3 }
0x1249   : > { %v1167_v46 = vadd.f32 %v1164_v45, %v1144_v44 }
0x124b   : > { %v1496_v47 = vmul.f32 -1.442695, %v1167_v46 }
0x124d   : > { %1632 = vpow2.f32 %v1496_v47 }
0x1253   : > { %v1633_v48 = vpop.eup %1632 }
0x1254   : > { %v1171_v49 = vadd.f32 1.0, %v1633_v48 }
0x1256   : > { %1634 = vrcp.f32 %v1171_v49  ;;  %v1183_v53 = vand.u32 2147483648, %v1171_v49  ;;  %v1181_v56 = vand.u32 2147483647, %v1171_v49  ;;  %vm1177_vm7 = vweird.f32 %v1171_v49 }
0x1257   : > { %1636 = vtanh.f32 %v1167_v46 }
0x1258   : > { %v1184_v58 = vor.u32 1.1754944e-38, %v1183_v53  ;;  %vm1182_vm10 = vcmp.eq.f32.partialorder %v1181_v56, 8.507059e+37 }
0x125c   : > { %v1635_v50 = vpop.eup %1634 }
0x125d   : > { %v1173_v51 = vmul.f32 %v1635_v50, %v1171_v49  ;;  %vm1178_vm6 = vweird.f32 %v1635_v50  ;;  %v1637_v60 = vpop.eup %1636 }
0x125e   : > { %vm1179_vm9 = vmor %vm1177_vm7, %vm1178_vm6 }
0x125f   : > { %v1174_v52 = vsub.f32 1.0, %v1173_v51 }
0x1261   : > { %v1175_v55 = vmul.f32 %v1635_v50, %v1174_v52 }
0x1263   : > { %v1176_v57 = vadd.f32 %v1635_v50, %v1175_v55 }
0x1265   : > { %v1180_v59 = vsel %vm1179_vm9, %v1635_v50, %v1176_v57 }
0x1266   : > { %v1185_v61 = vsel %vm1182_vm10, %v1184_v58, %v1180_v59 }
0x1267   : > { %v1188_v62 = vsel %vm1899_vm4, %v1637_v60, %v1185_v61 }
0x1268   : > { %1191 = vrot.lane.b32.xlu2 %v1188_v62, %s1688_s16  ;;  %v1189_v1 = vmul.f32 %v1188_v62, %v1132_v39 }
0x12c2   : > { %v1192_v63 = vpop.permute.xlu2 %1191 }
0x12c3   : > { %v1194_v0 = vmul.f32 %v1192_v63, %v1188_v62 }
0x12c5   : > { %1196 = vrot.lane.b32.xlu0 %v1194_v0, %s1689_s19 }
0x1337   : > { %v1197_v2 = vpop.permute.xlu0 %1196 }
0x1338   : > { %v1199_v3 = vadd.f32 %v1197_v2, %v1189_v1 }
0x133a   : > { %1638 = vtanh.f32 %v1199_v3 }
0x1340   : > { %v1639_v4 = vpop.eup %1638 }
0x1341   : > { %1202 = vrot.lane.b32.xlu1 %v1639_v4, %s1688_s16 }
0x13b3   : > { %v1203_v5 = vpop.permute.xlu1 %1202 }
0x13b4   : > { %v1205_v6 = vmul.f32 %v1203_v5, %v1188_v62 }
0x13b6   : > { %1207 = vrot.lane.b32.xlu2 %v1205_v6, %s1689_s19 }
0x1410   : > { %v1208_v8 = vpop.permute.xlu2 %1207 }
0x1411   : > { %1210 = vst.msk [vmem:[#allocation3 + $0xe] sm:$0x3] %vm740_vm8, %v1208_v8 }
0x1412   : > { %1211 = vst.msk [vmem:[%s2027_s13] sm:$0x3] %vm740_vm8, %v1208_v8 }
0x1418   : > { %v1218_v10 = vld [vmem:[#allocation3 + $0x8] sm:$0xff] }
0x1419   : > { %v1219_v11 = vpack.c.bf16 %v1218_v10, %v1217_v9 }
0x141b   : > { %1505 = vmatmul.msk.bf16.vlgmr.msrb.gmra.mxu0 %vm634_vm0, %v1219_v11  ;;  %vm1296_vm0 = vcmask 523264  }
0x1498   : > { %v1252_v16 = vpop.f32.mrf.mxu0 }
0x1499   : > { %v1253_v18 = vadd.f32 %v1574_v17, %v1252_v16 }
0x149b   : > { %v1257_v21 = vmax.f32 %v1253_v18, 0.0 }
0x14a0   : > { %v1254_v19 = vpop.f32.mrf.mxu0 }
0x14a1   : > { %v1255_v20 = vadd.f32 %v1574_v17, %v1254_v19 }
0x14a3   : > { %v1258_v22 = vmax.f32 %v1255_v20, 0.0 }
0x14a5   : > { %v1259_v23 = vpack.c.bf16 %v1258_v22, %v1257_v21 }
0x14a7   : > { %1522 = vmatmul.msk.bf16.vlgmr.msrb.gmra.mxu1 %vm1296_vm0, %v1259_v23 }
0x1524   : > { %v1309_v25 = vpop.f32.mrf.mxu1 }
0x1525   : > { %v1310_v26 = vadd.f32 %v1575_v24, %v1309_v25 }
0x1527   : > { %1314 = vmax.xlane.f32.xlu0 %v1310_v26 }
0x152c   : > { %v1311_v27 = vpop.f32.mrf.mxu1 }
0x152d   : > { %v1312_v28 = vadd.f32 %v1575_v24, %v1311_v27 }
0x152f   : > { %1316 = vmax.xlane.f32.xlu1 %v1312_v28 }
0x153b   : > { %1213 = vrot.lane.b32.xlu0 %v1199_v3, %s1690_s24 }
0x159a   : > { %v1315_v29 = vpop.xlane.xlu0 %1314 }
0x159b   : > { %v1318_v30 = vsub.f32 %v1310_v26, %v1315_v29 }
0x159d   : > { %v1320_v31 = vmul.f32 1.442695, %v1318_v30 }
0x159f   : > { %1640 = vpow2.f32 %v1320_v31 }
0x15a2   : > { %v1317_v32 = vpop.xlane.xlu1 %1316 }
0x15a3   : > { %v1319_v33 = vsub.f32 %v1312_v28, %v1317_v32 }
0x15a5   : > { %v1641_v34 = vpop.eup %1640  ;;  %v1322_v35 = vmul.f32 1.442695, %v1319_v33 }
0x15a6   : > { %1324 = vadd.xlane.f32.xlu2 %v1641_v34 }
0x15a7   : > { %1642 = vpow2.f32 %v1322_v35 }
0x15ad   : > { %v1643_v36 = vpop.eup %1642  ;;  %v1214_v37 = vpop.permute.xlu0 %1213 }
0x15ae   : > { %1216 = vst.msk [vmem:[%s2028_s14] sm:$0x3] %vm740_vm8, %v1214_v37  ;;  %1326 = vadd.xlane.f32.xlu2 %v1643_v36 }
0x1619   : > { %v1325_v38 = vpop.xlane.xlu2 %1324 }
0x161a   : > { %1644 = vlog2.f32 %v1325_v38 }
0x1620   : > { %v1645_v39 = vpop.eup %1644 }
0x1621   : > { %v1329_v40 = vmul.f32 0.6931472, %v1645_v39  ;;  %v1327_v41 = vpop.xlane.xlu2 %1326 }
0x1622   : > { %1646 = vlog2.f32 %v1327_v41 }
0x1623   : > { %v1332_v42 = vsub.f32 %v1318_v30, %v1329_v40 }
0x1625   : > { %1334 = vst [vmem:[#allocation4] sm:$0xff] %v1332_v42 }
0x1628   : > { %v1647_v43 = vpop.eup %1646 }
0x1629   : > { %v1331_v44 = vmul.f32 0.6931472, %v1647_v43 }
0x162b   : > { %v1333_v45 = vsub.f32 %v1319_v33, %v1331_v44 }
0x162d   : > { %1335 = vst [vmem:[#allocation4 + $0x8] sm:$0xff] %v1333_v45 }
0x162e PF: > { %p1556_p5 = scmp.eq.s32.totalorder %s1775_s30, 1  ;;  %s1691_s27 = smov [#allocation4]  }
0x162f   : > { %s1341_s28 = sshll.u32 %s1691_s27, 4  ;;  %s1343_s17 = sshll.u32 %s2026_s12, 4  ;;  %s1342_s28 = int_to_ptr.vmem [resolvable:$true] %s1341_s28  ;;  %s1344_s17 = int_to_ptr.hbm [resolvable:$true] %s1343_s17 }
0x1630   : > { %s1692_s18 = smov 128   ;;  %s1693_s19 = smov 8  }
0x1631   : > { %1553 = dma.vmem_to_hbm [thread:$0]  (%p1556_p5), %s1342_s28, 256, %s1344_s17, [#allocation5], %s1692_s18, %s1692_s18, %s1693_s19  }
0x1632   : > { %1681 = dma.done.wait (%p1556_p5), [#allocation5], 256  }
0x1633   : > { %1683 = vsyncadd (%p1556_p5), [#allocation5], 4294967040 }
0x1634 PF: > { %s26_s29 = sadd.s32 1, %s1686_s29  }
0x1635   : > { %p23_p6 = scmp.ge.s32.totalorder %s26_s29, 4  }
0x1637   :  { %25 = sbr.rel (!%p23_p6) target bundleno = 1 (0x1), region = 116 }
0x163c   :  { %1372 = vsyncpa [#allocation5], 1 }
0x163d   :  { %1374 = vsyncpa [#allocation5 + $0x1], 1 }

</bundles_post_ra>
